<compile_context>
chip_gen: v7x
topology: tpu7x:2x2x1
jax: 0.10.0
libtpu: 0.0.40
codegen_flags: <defaults>
</compile_context>

<pallas_src>
import jax
import jax.numpy as jnp
from jax import lax
from jax.experimental import pallas as pl
from jax.experimental.pallas import tpu as pltpu

C_IN = 64
C_OUT = 3
K = 7
STRIDE = 2
PAD = 3
OUT_PAD = 1

TILE_H = 16  # output quotient-rows per grid step (multiple of 8); tunable
assert TILE_H % 8 == 0


def _defirst_kernel(x_ref, xh_ref, w_ref, b_ref, o_ref):
    """One (batch image, row strip) grid step.

    x_ref : (1, TH, WP, CIN)   bf16 main strip of the padded input
    xh_ref: (1, 8,  WP, CIN)   bf16 halo rows below the strip (first 3 used)
    w_ref : (4, 4*CIN, 12)     bf16 per-dy weights; K = (dx, ci), N = (py, px, co)
    b_ref : (1, 12)            f32 bias replicated over the 4 phases
    o_ref : (1, 1, TH*W, 12)   f32 phase-interleaved output block
    """
    th = x_ref.shape[1]
    cin = x_ref.shape[3]
    ncol = b_ref.shape[1]            # 12 = 2*2*C_OUT
    w_out = o_ref.shape[2] // th

    # Fused ReLU (padding zeros are unaffected: ReLU(0)=0).  bf16 throughout.
    strip = jnp.maximum(
        jnp.concatenate([x_ref[0], xh_ref[0, :3]], axis=0), 0.0)  # (TH+3, WP, CIN)

    # Hoisted dx-im2col, built ONCE per strip: (TH+3, W, 4*CIN) bf16.
    patches_all = jnp.concatenate(
        [strip[:, dxi:dxi + w_out, :] for dxi in range(4)], axis=-1)

    # 4 fat bf16 MXU matmuls (K=4*CIN=256, N=12), f32 accumulation in a value,
    # single store of the output block (bias folded into the final write).
    acc = None
    for dyi in range(4):
        p = patches_all[dyi:dyi + th].reshape(th * w_out, 4 * cin)   # free slice
        d = jnp.dot(p, w_ref[dyi], preferred_element_type=jnp.float32)
        acc = d if acc is None else acc + d
    o_ref[0, 0] = acc + b_ref[...]


def _phase_weights(weight):
    """Pack PyTorch ConvTranspose2d weight (Cin, Cout, kh, kw) into the exact
    matmul layout: (dy_idx, dx_idx*Cin + ci, py*6 + px*3 + co)."""
    wf = jnp.zeros((2, 4, 2, 4, C_IN, C_OUT), weight.dtype)
    for py in range(2):
        for dyi in range(4):
            kh = (3 if py == 0 else 4) - 2 * (dyi - 1)
            if not 0 <= kh < K:
                continue
            for px in range(2):
                for dxi in range(4):
                    kw = (3 if px == 0 else 4) - 2 * (dxi - 1)
                    if not 0 <= kw < K:
                        continue
                    wf = wf.at[py, dyi, px, dxi].set(weight[:, :, kh, kw])
    # (py, dy, px, dx, ci, co) -> (dy, dx, ci, py, px, co) -> (4, 4*Cin, 12)
    return jnp.transpose(wf, (1, 3, 4, 0, 2, 5)).reshape(4, 4 * C_IN, 4 * C_OUT)


@jax.jit
def defirstlayer_forward(x_nchw, weight, bias):
    """Forward of deFirstlayer.

    x_nchw: (N, 64, H, W) f32;  weight: (64, 3, 7, 7) f32 (ConvTranspose2d IOHW);
    bias: (3,) f32.  Returns (N, 3, 2H, 2W) f32 (NCHW), matching PyTorch.
    """
    n, c, h, w = x_nchw.shape
    assert c == C_IN
    th = max(8, min(TILE_H, -(-h // 8) * 8))   # don't over-tile tiny images
    s = -(-h // th)                            # number of row strips
    hp = s * th + 8                            # padded rows (1 top + bottom slab)
    wp = w + 3                                 # padded cols (1 left, 2 right)

    # NCHW -> NHWC, zero pad, cast ONCE to bf16 (halves input HBM/VMEM bytes).
    # TODO(synk): fuse this transpose/pad into the kernel to drop the HBM pass.
    x_nhwc = jnp.transpose(x_nchw, (0, 2, 3, 1)).astype(jnp.bfloat16)
    xpad = jnp.pad(x_nhwc, ((0, 0), (1, hp - 1 - h), (1, 2), (0, 0)))

    w4 = _phase_weights(weight).astype(jnp.bfloat16)   # (4, 256, 12), VMEM-resident
    b12 = jnp.tile(bias, 4).reshape(1, 4 * C_OUT).astype(jnp.float32)

    # Explicit scoped-VMEM budget: double-buffered blocks + bf16 patches slab.
    vmem_bytes = (
        2 * th * wp * C_IN * 2           # main strip (bf16), double-buffered
        + 2 * 8 * wp * C_IN * 2          # halo (bf16), double-buffered
        + 2 * th * w * 128 * 4           # output block (12 lanes pad to 128), dbuf
        + 4 * 4 * C_IN * 4 * C_OUT * 2   # packed bf16 weights
        + (th + 3) * w * 4 * C_IN * 2    # in-kernel bf16 patches slab
    )
    vmem_limit = int(min(max(4 * vmem_bytes, 16 * 1024 * 1024), 56 * 1024 * 1024))

    out_k = pl.pallas_call(
        _defirst_kernel,
        out_shape=jax.ShapeDtypeStruct((n, s, th * w, 4 * C_OUT), jnp.float32),
        grid_spec=pltpu.PrefetchScalarGridSpec(
            num_scalar_prefetch=0,
            grid=(n, s),
            in_specs=[
                # main strip: padded rows [j*TH, (j+1)*TH)
                pl.BlockSpec((1, th, wp, C_IN), lambda i, j: (i, j, 0, 0)),
                # halo: padded rows [(j+1)*TH, (j+1)*TH + 8) of the same array
                pl.BlockSpec((1, 8, wp, C_IN),
                             lambda i, j: (i, (j + 1) * (th // 8), 0, 0)),
                pl.BlockSpec((4, 4 * C_IN, 4 * C_OUT), lambda i, j: (0, 0, 0)),
                pl.BlockSpec((1, 4 * C_OUT), lambda i, j: (0, 0)),
            ],
            out_specs=pl.BlockSpec((1, 1, th * w, 4 * C_OUT),
                                   lambda i, j: (i, j, 0, 0)),
        ),
        compiler_params=pltpu.CompilerParams(
            dimension_semantics=("parallel", "parallel"),
            vmem_limit_bytes=vmem_limit),
    )(xpad, xpad, w4, b12)

    # (n, s, TH*W, 12) -> (n, s, qy, qx, py, px, co) -> (n, 2H, 2W, 3) -> NCHW.
    out = out_k.reshape(n, s, th, w, 2, 2, C_OUT)
    out = jnp.transpose(out, (0, 1, 2, 4, 3, 5, 6)).reshape(
        n, s * th * 2, 2 * w, C_OUT)
    out = out[:, :2 * h]
    return jnp.transpose(out, (0, 3, 1, 2))


def _reference(x_nchw, weight, bias):
    """Pure-JAX reference (ConvTranspose2d equivalent via dilated conv)."""
    xr = jnp.maximum(x_nchw, 0.0)
    w_flip = jnp.transpose(weight[:, :, ::-1, ::-1], (1, 0, 2, 3))  # OIHW
    lo = K - 1 - PAD
    hi = K - 1 - PAD + OUT_PAD
    out = lax.conv_general_dilated(
        xr, w_flip,
        window_strides=(1, 1),
        padding=[(lo, hi), (lo, hi)],
        lhs_dilation=(STRIDE, STRIDE),
        dimension_numbers=("NCHW", "OIHW", "NCHW"),
        precision=lax.Precision.HIGHEST)
    return out + bias[None, :, None, None]


if __name__ == "__main__":
    key = jax.random.PRNGKey(0)
    kx, kw, kb = jax.random.split(key, 3)

    N, H, W = 2, 16, 16
    x = jax.random.normal(kx, (N, C_IN, H, W), jnp.float32)
    # Deterministic synthetic parameters (shape of nn.ConvTranspose2d(64, 3, 7)):
    weight = jax.random.normal(kw, (C_IN, C_OUT, K, K), jnp.float32) * 0.05
    bias = jax.random.normal(kb, (C_OUT,), jnp.float32) * 0.1

    out = defirstlayer_forward(x, weight, bias)
    out = jax.block_until_ready(out)

    ref = _reference(x, weight, bias)
    assert out.shape == (N, C_OUT, 2 * H, 2 * W), out.shape
    max_err = float(jnp.max(jnp.abs(out - ref)))
    # bf16 MXU operands with f32 accumulation vs. f32 HIGHEST reference:
    # expected |err| ~ 1e-2 at these magnitudes (K_eff ~ 1000, |w| ~ 0.05).
    assert jnp.allclose(out, ref, atol=2e-2, rtol=2e-2), max_err

    print("KERNEL_OK")
</pallas_src>

<mosaic_0001>
module attributes {stable_mosaic.version = 11 : i64} {
  func.func @_defirst_kernel(%arg0: i32, %arg1: i32, %arg2: memref<1x16x19x64xbf16, #tpu.memory_space<vmem>>, %arg3: memref<1x8x19x64xbf16, #tpu.memory_space<vmem>>, %arg4: memref<4x256x12xbf16, #tpu.memory_space<vmem>>, %arg5: memref<1x12xf32, #tpu.memory_space<vmem>>, %arg6: memref<1x1x256x12xf32, #tpu.memory_space<vmem>>) attributes {dimension_semantics = [#tpu.dimension_semantics<parallel>, #tpu.dimension_semantics<parallel>], iteration_bounds = array<i64: 2, 1>, scalar_prefetch = 0 : i64, scratch_operands = 0 : i64, tpu.core_type = #tpu.core_type<tc>, window_params = [{transform_indices = @transform_0, window_bounds = array<i64: 1, 16, 19, 64>}, {transform_indices = @transform_1, window_bounds = array<i64: 1, 8, 19, 64>}, {pipeline_mode = #tpu.pipeline_mode<synchronous>, transform_indices = @transform_2, window_bounds = array<i64: 4, 256, 12>}, {pipeline_mode = #tpu.pipeline_mode<synchronous>, transform_indices = @transform_3, window_bounds = array<i64: 1, 12>}, {transform_indices = @transform_4, window_bounds = array<i64: 1, 1, 256, 12>}]} {
    %c0 = arith.constant 0 : index
    %c0_0 = arith.constant 0 : index
    %c0_1 = arith.constant 0 : index
    %c0_2 = arith.constant 0 : index
    %0 = vector.load %arg2[%c0, %c0_0, %c0_1, %c0_2] : memref<1x16x19x64xbf16, #tpu.memory_space<vmem>>, vector<1x16x19x64xbf16>
    %1 = vector.shape_cast %0 : vector<1x16x19x64xbf16> to vector<16x19x64xbf16>
    %c0_3 = arith.constant 0 : index
    %c0_4 = arith.constant 0 : index
    %c0_5 = arith.constant 0 : index
    %c0_6 = arith.constant 0 : index
    %2 = vector.load %arg3[%c0_3, %c0_4, %c0_5, %c0_6] : memref<1x8x19x64xbf16, #tpu.memory_space<vmem>>, vector<1x3x19x64xbf16>
    %3 = vector.shape_cast %2 : vector<1x3x19x64xbf16> to vector<3x19x64xbf16>
    %4 = tpu.concatenate %1, %3 in 0 : vector<16x19x64xbf16>, vector<3x19x64xbf16> -> vector<19x19x64xbf16>
    %cst = arith.constant 0.000000e+00 : bf16
    %5 = vector.broadcast %cst : bf16 to vector<19x19x64xbf16>
    %6 = arith.maximumf %4, %5 : vector<19x19x64xbf16>
    %7 = vector.extract_strided_slice %6 {offsets = [0, 0, 0], sizes = [19, 16, 64], strides = [1, 1, 1]} : vector<19x19x64xbf16> to vector<19x16x64xbf16>
    %8 = vector.extract_strided_slice %6 {offsets = [0, 1, 0], sizes = [19, 16, 64], strides = [1, 1, 1]} : vector<19x19x64xbf16> to vector<19x16x64xbf16>
    %9 = vector.extract_strided_slice %6 {offsets = [0, 2, 0], sizes = [19, 16, 64], strides = [1, 1, 1]} : vector<19x19x64xbf16> to vector<19x16x64xbf16>
    %10 = vector.extract_strided_slice %6 {offsets = [0, 3, 0], sizes = [19, 16, 64], strides = [1, 1, 1]} : vector<19x19x64xbf16> to vector<19x16x64xbf16>
    %11 = tpu.concatenate %7, %8, %9, %10 in 2 : vector<19x16x64xbf16>, vector<19x16x64xbf16>, vector<19x16x64xbf16>, vector<19x16x64xbf16> -> vector<19x16x256xbf16>
    %12 = vector.extract_strided_slice %11 {offsets = [0, 0, 0], sizes = [16, 16, 256], strides = [1, 1, 1]} : vector<19x16x256xbf16> to vector<16x16x256xbf16>
    %13 = vector.shape_cast %12 : vector<16x16x256xbf16> to vector<256x256xbf16>
    %c0_7 = arith.constant 0 : index
    %c0_8 = arith.constant 0 : index
    %c0_9 = arith.constant 0 : index
    %14 = vector.load %arg4[%c0_7, %c0_8, %c0_9] : memref<4x256x12xbf16, #tpu.memory_space<vmem>>, vector<1x256x12xbf16>
    %15 = vector.shape_cast %14 : vector<1x256x12xbf16> to vector<256x12xbf16>
    %cst_10 = arith.constant dense<0.000000e+00> : vector<256x12xf32>
    %16 = tpu.matmul %13, %15, %cst_10 {dimension_numbers = #tpu.dot_dimension_numbers<[1], [0], [0], [1], [0, 0, 1, 1], [], []>} : vector<256x256xbf16>, vector<256x12xbf16>, vector<256x12xf32> -> vector<256x12xf32>
    %17 = vector.extract_strided_slice %11 {offsets = [1, 0, 0], sizes = [16, 16, 256], strides = [1, 1, 1]} : vector<19x16x256xbf16> to vector<16x16x256xbf16>
    %18 = vector.shape_cast %17 : vector<16x16x256xbf16> to vector<256x256xbf16>
    %c1 = arith.constant 1 : index
    %c0_11 = arith.constant 0 : index
    %c0_12 = arith.constant 0 : index
    %19 = vector.load %arg4[%c1, %c0_11, %c0_12] : memref<4x256x12xbf16, #tpu.memory_space<vmem>>, vector<1x256x12xbf16>
    %20 = vector.shape_cast %19 : vector<1x256x12xbf16> to vector<256x12xbf16>
    %cst_13 = arith.constant dense<0.000000e+00> : vector<256x12xf32>
    %21 = tpu.matmul %18, %20, %cst_13 {dimension_numbers = #tpu.dot_dimension_numbers<[1], [0], [0], [1], [0, 0, 1, 1], [], []>} : vector<256x256xbf16>, vector<256x12xbf16>, vector<256x12xf32> -> vector<256x12xf32>
    %22 = arith.addf %16, %21 : vector<256x12xf32>
    %23 = vector.extract_strided_slice %11 {offsets = [2, 0, 0], sizes = [16, 16, 256], strides = [1, 1, 1]} : vector<19x16x256xbf16> to vector<16x16x256xbf16>
    %24 = vector.shape_cast %23 : vector<16x16x256xbf16> to vector<256x256xbf16>
    %c2 = arith.constant 2 : index
    %c0_14 = arith.constant 0 : index
    %c0_15 = arith.constant 0 : index
    %25 = vector.load %arg4[%c2, %c0_14, %c0_15] : memref<4x256x12xbf16, #tpu.memory_space<vmem>>, vector<1x256x12xbf16>
    %26 = vector.shape_cast %25 : vector<1x256x12xbf16> to vector<256x12xbf16>
    %cst_16 = arith.constant dense<0.000000e+00> : vector<256x12xf32>
    %27 = tpu.matmul %24, %26, %cst_16 {dimension_numbers = #tpu.dot_dimension_numbers<[1], [0], [0], [1], [0, 0, 1, 1], [], []>} : vector<256x256xbf16>, vector<256x12xbf16>, vector<256x12xf32> -> vector<256x12xf32>
    %28 = arith.addf %22, %27 : vector<256x12xf32>
    %29 = vector.extract_strided_slice %11 {offsets = [3, 0, 0], sizes = [16, 16, 256], strides = [1, 1, 1]} : vector<19x16x256xbf16> to vector<16x16x256xbf16>
    %30 = vector.shape_cast %29 : vector<16x16x256xbf16> to vector<256x256xbf16>
    %c3 = arith.constant 3 : index
    %c0_17 = arith.constant 0 : index
    %c0_18 = arith.constant 0 : index
    %31 = vector.load %arg4[%c3, %c0_17, %c0_18] : memref<4x256x12xbf16, #tpu.memory_space<vmem>>, vector<1x256x12xbf16>
    %32 = vector.shape_cast %31 : vector<1x256x12xbf16> to vector<256x12xbf16>
    %cst_19 = arith.constant dense<0.000000e+00> : vector<256x12xf32>
    %33 = tpu.matmul %30, %32, %cst_19 {dimension_numbers = #tpu.dot_dimension_numbers<[1], [0], [0], [1], [0, 0, 1, 1], [], []>} : vector<256x256xbf16>, vector<256x12xbf16>, vector<256x12xf32> -> vector<256x12xf32>
    %34 = arith.addf %28, %33 : vector<256x12xf32>
    %c0_20 = arith.constant 0 : index
    %c0_21 = arith.constant 0 : index
    %35 = vector.load %arg5[%c0_20, %c0_21] : memref<1x12xf32, #tpu.memory_space<vmem>>, vector<1x12xf32>
    %36 = vector.broadcast %35 : vector<1x12xf32> to vector<256x12xf32>
    %37 = arith.addf %34, %36 : vector<256x12xf32>
    %c0_22 = arith.constant 0 : index
    %c0_23 = arith.constant 0 : index
    %c0_24 = arith.constant 0 : index
    %c0_25 = arith.constant 0 : index
    %38 = vector.load %arg6[%c0_22, %c0_23, %c0_24, %c0_25] : memref<1x1x256x12xf32, #tpu.memory_space<vmem>>, vector<1x1x256x12xf32>
    %39 = vector.shape_cast %38 : vector<1x1x256x12xf32> to vector<256x12xf32>
    %40 = vector.shape_cast %37 : vector<256x12xf32> to vector<1x1x256x12xf32>
    tpu.vector_store %arg6[%c0_22, %c0_23, %c0_24, %c0_25], %40 {strides = array<i32>} : memref<1x1x256x12xf32, #tpu.memory_space<vmem>>, vector<1x1x256x12xf32>,
    return
  }
  func.func @transform_0(%arg0: i32, %arg1: i32) -> (i32, i32, i32, i32) {
    %c0_i32 = arith.constant 0 : i32
    %c0_i32_0 = arith.constant 0 : i32
    %c0_i32_1 = arith.constant 0 : i32
    return %arg0, %arg1, %c0_i32, %c0_i32_0 : i32, i32, i32, i32
  }
  func.func @transform_1(%arg0: i32, %arg1: i32) -> (i32, i32, i32, i32) {
    %c1_i32 = arith.constant 1 : i32
    %0 = arith.addi %arg1, %c1_i32 : i32
    %c2_i32 = arith.constant 2 : i32
    %1 = arith.muli %0, %c2_i32 : i32
    %c0_i32 = arith.constant 0 : i32
    %c0_i32_0 = arith.constant 0 : i32
    %c0_i32_1 = arith.constant 0 : i32
    return %arg0, %1, %c0_i32, %c0_i32_0 : i32, i32, i32, i32
  }
  func.func @transform_2(%arg0: i32, %arg1: i32) -> (i32, i32, i32) {
    %c0_i32 = arith.constant 0 : i32
    %c0_i32_0 = arith.constant 0 : i32
    %c0_i32_1 = arith.constant 0 : i32
    %c0_i32_2 = arith.constant 0 : i32
    return %c0_i32, %c0_i32_0, %c0_i32_1 : i32, i32, i32
  }
  func.func @transform_3(%arg0: i32, %arg1: i32) -> (i32, i32) {
    %c0_i32 = arith.constant 0 : i32
    %c0_i32_0 = arith.constant 0 : i32
    %c0_i32_1 = arith.constant 0 : i32
    return %c0_i32, %c0_i32_0 : i32, i32
  }
  func.func @transform_4(%arg0: i32, %arg1: i32) -> (i32, i32, i32, i32) {
    %c0_i32 = arith.constant 0 : i32
    %c0_i32_0 = arith.constant 0 : i32
    %c0_i32_1 = arith.constant 0 : i32
    return %arg0, %arg1, %c0_i32, %c0_i32_0 : i32, i32, i32, i32
  }
}

</mosaic_0001>

<bundles_post_ra>
// kernel: tile.9
= control target key start
LH: loop header
LB: loop body
LE: loop exit
PB: predicated region body
PF: predicated region fallthrough
CT: control target
= control target key end

     0   :  { %vm7_vm0 = vcmask 23552   ;;  %s37_s8 = smov 3   ;;  %s38_s9 = smov 6   ;;  %vm13_vm1 = vcmask 97352   ;;  %vm19_vm2 = vcmask 72752   ;;  %vm25_vm3 = vcmask 48152   ;;  %s55_s0 = inlined_call_operand.vmem [shape: f32[4,3], index: 0, kind: input, shape index: {}]   ;;  %s56_s1 = inlined_call_operand.vmem [shape: f32[1,12], index: 1, kind: output, shape index: {}]  }
   0x1   :  { %v4_v0 = vld [vmem:[%s55_s0] sm:$0xf]  ;;  %s36_s0 = smov 9  }
   0x2   :  { %5 = vst [vmem:[#allocation1] sm:$0xf] %v4_v0 }
   0x9   :  { %v10_v1 = vld [vmem:[#allocation1 + $0x3] sm:$0x1]   ;;  %v22_v2 = vld [vmem:[#allocation1 + $0x1] sm:$0x1]   ;;  %v6_v3 = vld [vmem:[#allocation1] sm:$0x1]  }
   0xa   :  { %11 = vrot.lane.b32.xlu0 %v10_v1, %s36_s0  ;;  %23 = vrot.lane.b32.xlu1 %v22_v2, %s37_s8  ;;  %v16_v4 = vld [vmem:[#allocation1 + $0x2] sm:$0x1]   ;;  %8 = vst.msk [vmem:[#allocation0] sm:$0x1] %vm7_vm0, %v6_v3  }
   0xe   :  { %17 = vrot.lane.b32.xlu0 %v16_v4, %s38_s9 }
  0x7c   :  { %v12_v5 = vpop.permute.xlu0 %11   ;;  %v24_v6 = vpop.permute.xlu1 %23  }
  0x7d   :  { %14 = vst.msk [vmem:[#allocation0] sm:$0x1] %vm13_vm1, %v12_v5  }
  0x80   :  { %v18_v7 = vpop.permute.xlu0 %17  }
  0x81   :  { %20 = vst.msk [vmem:[#allocation0] sm:$0x1] %vm19_vm2, %v18_v7  }
  0x82   :  { %26 = vst.msk [vmem:[#allocation0] sm:$0x1] %vm25_vm3, %v24_v6  }
  0x89   :  { %v30_v8 = vld [vmem:[#allocation0] sm:$0x1] }
  0x8a   :  { %32 = vst [vmem:[%s56_s1] sm:$0x1] %v30_v8 }

// kernel: tile.8
= control target key start
LH: loop header
LB: loop body
LE: loop exit
PB: predicated region body
PF: predicated region fallthrough
CT: control target
= control target key end

     0   :  { %2 = vsyncpa [#allocation1], 0  ;;  %s44_s6 = smov [#allocation0]   ;;  %s70_s0 = inlined_call_operand.hbm [shape: f32[3], index: 0, kind: input, shape index: {}]   ;;  %s71_s1 = inlined_call_operand.vmem [shape: f32[4,3], index: 1, kind: output, shape index: {}]  }
   0x1   :  { %s9_s7 = sshll.u32 %s44_s6, 4  ;;  %s20_s10 = scalar_lea.hbm %s70_s0, 16  ;;  %s10_s7 = int_to_ptr.vmem [resolvable:$true] %s9_s7 }
   0x2   :  { %p21_p0 = scmp.ne.s32.totalorder %s70_s0, %s20_s10  ;;  %p24_p1 = scmp.lt.u32.totalorder %s20_s10, %s70_s0 }
   0x4   :  { %p26_p2 = pnand %p24_p1, %p21_p0 }
   0x6   :  { %29 = shalt.err (!%p26_p2)
}
   0x7   :  { %s30_s15 = scalar_lea.vmem %s10_s7, 16  ;;  %s34_s16 = scalar_lea.vmem %s10_s7, 32 }
   0x8   :  { %p31_p3 = scmp.ne.s32.totalorder %s10_s7, %s30_s15  ;;  %p35_p4 = scmp.lt.s32.totalorder %s10_s7, %s10_s7 }
   0x9   :  { %p36_p5 = scmp.lt.s32.totalorder %s34_s16, %s30_s15 }
   0xb   :  { %p37_p6 = por %p36_p5, %p35_p4 }
   0xd   :  { %p38_p7 = pnand %p37_p6, %p31_p3 }
   0xf   :  { %41 = shalt.err (!%p38_p7)
}
  0x10   :  { %12 = dma.hbm_to_vmem [thread:$0]  %s70_s0, 16, %s10_s7, [#allocation1]  }
  0x11   :  { %42 = dma.done.wait [#allocation1], 16  }
  0x12   :  { %43 = vsyncadd [#allocation1], 4294967280  ;;  %v16_v0 = vld [vmem:[#allocation0] ss:$0 sm:$0xff] }
  0x13   :  { %17 = vst [vmem:[%s71_s1] sm:$0xf] %v16_v0 }
  0x14   :  { %18 = vsyncpa [#allocation1], 1 }

// kernel: defirstlayer_forward.1
= control target key start
LH: loop header
LB: loop body
LE: loop exit
PB: predicated region body
PF: predicated region fallthrough
CT: control target
= control target key end

     0   :  { %s3466_s15 = smov 0   ;;  %s3468_s16 = smov 0   ;;  %s4537_s0 = inlined_call_operand.vmem [shape: bf16[2,24,19,64], index: 0, kind: input, shape index: {}, may-alias: {0,1}]   ;;  %s4538_s1 = inlined_call_operand.vmem [shape: bf16[2,24,19,64], index: 1, kind: input, shape index: {}, may-alias: {0,1}]   ;;  %s4539_s2 = inlined_call_operand.vmem [shape: bf16[4,256,12], index: 2, kind: input, shape index: {}]   ;;  %s4540_s3 = inlined_call_operand.vmem [shape: f32[1,12], index: 3, kind: input, shape index: {}]   ;;  %s4541_s4 = inlined_call_operand.vmem [shape: f32[2,1,256,12], index: 4, kind: output, shape index: {}]  }
   0x1   :  { %s3470_s17 = smov 0  }
   0x2 LB: > { %s26_s18 = sadd.s32 1, %s3433_s16  ;;  %p2665_p0 = scmp.ge.s32.totalorder %s3437_s17, 1  ;;  %s3437_s17 = sphi %s3470_s17, %s14_s17   ;;  %s3433_s16 = sphi %s3468_s16, %s4543_s16   ;;  %s3429_s15 = sphi %s3466_s15, %s4542_s15  }
   0x3   : > { %p28_p1 = scmp.ge.s32.totalorder %s26_s18, 2  ;;  %p220_p2 = scmp.lt.s32.totalorder %s3437_s17, 3 }
   0x5   : > { %s4545_s18 = smov (%p28_p1, %s26_s18), 0  ;;  %p221_p3 = pnand %p2665_p0, %p220_p2 }
   0x6   : > { %p278_p4 = scmp.lt.s32.totalorder (!%p221_p3), %s3429_s15, 1  ;;  %v3351_v0 = vld [vmem:[%s4539_s2 + $0xc0] sm:$0xff] (!%p221_p3)   ;;  %v3355_v4 = vld [vmem:[%s4539_s2 + $0xc8] sm:$0xff] (!%p221_p3)   ;;  %vm909_vm0 = vsmask.f32 (!%p221_p3), 6400  ;;  %v3439_v9 = vmov (!%p221_p3), 0  }
   0x7   : > { %224 = sbr.rel (%p221_p3) target bundleno = 622 (0x26e), region = 36  ;;  %2874 = vmatprep.subr.bf16.mxu0 (!%p221_p3), %v3351_v0  ;;  %v3352_v1 = vld [vmem:[%s4539_s2 + $0x80] sm:$0xff] (!%p221_p3)   ;;  %v3356_v5 = vld [vmem:[%s4539_s2 + $0x88] sm:$0xff] (!%p221_p3)   ;;  %vm584_vm1 = vsmask.f32 (!%p221_p3), 7424  ;;  %s3440_s9 = smov (!%p221_p3), 64  }
   0x8   : > { %v3353_v2 = vld [vmem:[%s4539_s2 + $0x40] sm:$0xff] (!%p221_p3)   ;;  %2875 = vmatpush3.bf16.msra.mxu0 (!%p221_p3), %v3352_v1  ;;  %vm851_vm2 = vcmask (!%p221_p3), 1046528   ;;  %vm1119_vm3 = vcmask (!%p221_p3), 523264   ;;  %vm2515_vm4 = vcmask (!%p221_p3), 97280  }
   0x9   : > { %v3354_v3 = vld [vmem:[%s4539_s2] sm:$0xff] (!%p221_p3)   ;;  %2986 = vmatprep.subr.bf16.mxu1 (!%p221_p3), %v3353_v2  ;;  %2876 = vmatprep.subr.bf16.mxu0 (!%p221_p3), %v3355_v4 }
   0xa   : > { %2987 = vmatpush3.bf16.msra.mxu1 (!%p221_p3), %v3354_v3 }
   0xc   : > { %2877 = vmatpush3.bf16.msra.mxu0 (!%p221_p3), %v3356_v5  ;;  %v3357_v5 = vld [vmem:[%s4539_s2 + $0x48] sm:$0xff] (!%p221_p3)  }
   0xd   : > { %2988 = vmatprep.subr.bf16.mxu1 (!%p221_p3), %v3357_v5 }
   0xe   : > { %s4547_s15 = smov (!%p278_p4, %s3429_s15), 1 }
   0xf   : > { %s3322_s25 = smul.u32 288, %s4547_s15  ;;  %s2873_s7 = sshll.u32 %s4547_s15, 8 }
  0x10   : > { %s4400_s11 = scalar_lea.vmem %s4541_s4, %s2873_s7 }
  0x11   : > { %s3507_s6 = scalar_lea.vmem %s4537_s0, %s3322_s25  ;;  %s2872_s8 = sadd.s32 192, %s3322_s25 }
  0x12   : > { %v321_v6 = vld [vmem:[%s3507_s6 + $0xc] sm:$0xf]  ;;  %v322_v7 = vld [vmem:[%s3507_s6 + $0x10] sm:$0xf]  ;;  %v323_v8 = vld [vmem:[%s3507_s6 + $0x14] sm:$0x3]  ;;  %s3870_s10 = scalar_lea.vmem %s4538_s1, %s2872_s8 }
  0x13   : > { %v378_v10 = vmax.bf16 %v3439_v9, %v321_v6  ;;  %v379_v11 = vmax.bf16 %v3439_v9, %v322_v7  ;;  %v380_v12 = vmax.bf16 %v3439_v9, %v323_v8  ;;  %v318_v13 = vld [vmem:[%s3507_s6] sm:$0xf]  ;;  %v319_v14 = vld [vmem:[%s3507_s6 + $0x4] sm:$0xf]  ;;  %v320_v15 = vld [vmem:[%s3507_s6 + $0x8] sm:$0x3] }
  0x14   : > { %v375_v16 = vmax.bf16 %v3439_v9, %v318_v13  ;;  %v376_v17 = vmax.bf16 %v3439_v9, %v319_v14  ;;  %v377_v18 = vmax.bf16 %v3439_v9, %v320_v15  ;;  %v324_v19 = vld [vmem:[%s3507_s6 + $0x18] sm:$0xf]  ;;  %v325_v20 = vld [vmem:[%s3507_s6 + $0x1c] sm:$0xf]  ;;  %v326_v21 = vld [vmem:[%s3507_s6 + $0x20] sm:$0x3] }
  0x15   : > { %v3527_v22 = vcombine.low %v378_v10, %v379_v11  ;;  %v3529_v23 = vcombine.low %v380_v12, %v380_v12  ;;  %v381_v24 = vmax.bf16 %v3439_v9, %v324_v19  ;;  %v382_v25 = vmax.bf16 %v3439_v9, %v325_v20  ;;  %v327_v26 = vld [vmem:[%s3507_s6 + $0x24] sm:$0xf]  ;;  %v328_v51 = vld [vmem:[%s3507_s6 + $0x28] sm:$0xf]  ;;  %v329_v52 = vld [vmem:[%s3507_s6 + $0x2c] sm:$0x3] }
  0x16   : > { %v3534_v27 = vcombine.low %v375_v16, %v376_v17  ;;  %v3536_v28 = vcombine.low %v377_v18, %v377_v18  ;;  %v383_v29 = vmax.bf16 %v3439_v9, %v326_v21  ;;  %v384_v30 = vmax.bf16 %v3439_v9, %v327_v26  ;;  %v3358_v11 = vld [vmem:[%s4539_s2 + $0x8] sm:$0xff]   ;;  %v330_v16 = vld [vmem:[%s3507_s6 + $0x30] sm:$0xf]  ;;  %v331_v21 = vld [vmem:[%s3507_s6 + $0x34] sm:$0xf] }
  0x17   : > { %v598_v31 = vshrl.u32 %v3527_v22, 16  ;;  %v600_v32 = vshll.u32 %v3527_v22, 16  ;;  %v605_v33 = vshll.u32 %v3529_v23, 16  ;;  %v922_v34 = vshrl.u32 %v3529_v23, 16  ;;  %2989 = vmatpush3.bf16.msra.mxu1 %v3358_v11 }
  0x18   : > { %v586_v35 = vshrl.u32 %v3534_v27, 16  ;;  %v588_v36 = vshll.u32 %v3534_v27, 16  ;;  %v593_v37 = vshll.u32 %v3536_v28, 16  ;;  %v913_v38 = vshrl.u32 %v3536_v28, 16 }
  0x19   : > { %v919_v39 = vrot.slane %v598_v31, 1  ;;  %v920_v40 = vrot.slane %v600_v32, 2  ;;  %v924_v41 = vrot.slane %v922_v34, 1  ;;  %v925_v42 = vrot.slane %v605_v33, 2 }
  0x1a   : > { %v910_v43 = vrot.slane %v586_v35, 1  ;;  %v911_v44 = vrot.slane %v588_v36, 2  ;;  %v915_v45 = vrot.slane %v913_v38, 1  ;;  %v916_v46 = vrot.slane %v593_v37, 2  ;;  %v336_v38 = vld [vmem:[%s3507_s6 + $0x48] sm:$0xf] }
  0x1b   : > { %v921_v47 = vor.u32 %v920_v40, %v919_v39  ;;  %v926_v48 = vor.u32 %v925_v42, %v924_v41  ;;  %v602_v49 = vrot.slane %v600_v32, 1  ;;  %v607_v50 = vrot.slane %v605_v33, 1  ;;  %v334_v32 = vld [vmem:[%s3507_s6 + $0x40] sm:$0xf]  ;;  %v335_v33 = vld [vmem:[%s3507_s6 + $0x44] sm:$0x3] }
  0x1c   : > { %v912_v53 = vor.u32 %v911_v44, %v910_v43  ;;  %v917_v54 = vor.u32 %v916_v46, %v915_v45  ;;  %v590_v55 = vrot.slane %v588_v36, 1  ;;  %v595_v56 = vrot.slane %v593_v37, 1  ;;  %v3359_v39 = vld [vmem:[%s4539_s2 + $0xd0] sm:$0xff]   ;;  %v337_v44 = vld [vmem:[%s3507_s6 + $0x4c] sm:$0xf] }
  0x1d   : > { %v927_v57 = vsel %vm909_vm0, %v921_v47, %v926_v48  ;;  %v603_v58 = vor.u32 %v602_v49, %v598_v31  ;;  %v3551_v59 = vcombine.low %v381_v24, %v382_v25  ;;  %v3553_v60 = vcombine.low %v383_v29, %v383_v29  ;;  %v332_v24 = vld [vmem:[%s3507_s6 + $0x38] sm:$0x3]  ;;  %v333_v31 = vld [vmem:[%s3507_s6 + $0x3c] sm:$0xf]  ;;  %v3360_v45 = vld [vmem:[%s4539_s2 + $0x90] sm:$0xff]   ;;  %2878 = vmatprep.subr.bf16.mxu0 %v3359_v39 }
  0x1e   : > { %1083 = vrot.lane.b32.xlu0 %v927_v57, %s3440_s9  ;;  %v918_v61 = vsel %vm909_vm0, %v912_v53, %v917_v54  ;;  %v591_v62 = vor.u32 %v590_v55, %v586_v35  ;;  %v385_v63 = vmax.bf16 %v3439_v9, %v328_v51  ;;  %v386_v0 = vmax.bf16 %v3439_v9, %v329_v52 }
  0x1f   : > { %1081 = vrot.lane.b32.xlu1 %v918_v61, %s3440_s9  ;;  %v608_v1 = vsel %vm584_vm1, %v603_v58, %v607_v50  ;;  %v610_v2 = vshrl.u32 %v3551_v59, 16  ;;  %v612_v3 = vshll.u32 %v3551_v59, 16  ;;  %v617_v4 = vshll.u32 %v3553_v60, 16  ;;  %v338_v50 = vld [vmem:[%s3507_s6 + $0x50] sm:$0x3]  ;;  %2879 = vmatpush3.bf16.msra.mxu0 %v3360_v45  ;;  %v3364_v45 = vld [vmem:[%s4539_s2 + $0x98] sm:$0xff]  }
  0x20   : > { %v596_v6 = vsel %vm584_vm1, %v591_v62, %v595_v56  ;;  %v931_v7 = vshrl.u32 %v3553_v60, 16  ;;  %v3569_v8 = vcombine.low %v384_v30, %v385_v63  ;;  %v3571_v10 = vcombine.low %v386_v0, %v386_v0 }
  0x21   : > { %v928_v12 = vrot.slane %v610_v2, 1  ;;  %v929_v13 = vrot.slane %v612_v3, 2  ;;  %v934_v14 = vrot.slane %v617_v4, 2  ;;  %v614_v15 = vrot.slane %v612_v3, 1 }
  0x22   : > { %815 = vrot.lane.b32.xlu0 %v608_v1, %s3440_s9  ;;  %v933_v17 = vrot.slane %v931_v7, 1  ;;  %v619_v18 = vrot.slane %v617_v4, 1  ;;  %v622_v19 = vshrl.u32 %v3569_v8, 16  ;;  %v624_v20 = vshll.u32 %v3569_v8, 16  ;;  %v3361_v4 = vld [vmem:[%s4539_s2 + $0x50] sm:$0xff]  }
  0x23   : > { %813 = vrot.lane.b32.xlu1 %v596_v6, %s3440_s9  ;;  %v930_v25 = vor.u32 %v929_v13, %v928_v12  ;;  %v615_v26 = vor.u32 %v614_v15, %v610_v2  ;;  %v629_v29 = vshll.u32 %v3571_v10, 16  ;;  %v940_v30 = vshrl.u32 %v3571_v10, 16  ;;  %v3362_v12 = vld [vmem:[%s4539_s2 + $0x10] sm:$0xff]   ;;  %v3363_v13 = vld [vmem:[%s4539_s2 + $0xd8] sm:$0xff]   ;;  %2990 = vmatprep.subr.bf16.mxu1 %v3361_v4  ;;  %v3367_v4 = vld [vmem:[%s4539_s2 + $0xe0] sm:$0xff]  }
  0x24   : > { %v935_v34 = vor.u32 %v934_v14, %v933_v17  ;;  %v937_v35 = vrot.slane %v622_v19, 1  ;;  %v938_v36 = vrot.slane %v624_v20, 2  ;;  %v626_v37 = vrot.slane %v624_v20, 1  ;;  %2991 = vmatpush3.bf16.msra.mxu1 %v3362_v12  ;;  %2880 = vmatprep.subr.bf16.mxu0 %v3363_v13 }
  0x25   : > { %v620_v40 = vsel %vm584_vm1, %v615_v26, %v619_v18  ;;  %v942_v41 = vrot.slane %v940_v30, 1  ;;  %v943_v42 = vrot.slane %v629_v29, 2  ;;  %v631_v43 = vrot.slane %v629_v29, 1  ;;  %v339_v30 = vld [vmem:[%s3507_s6 + $0x54] sm:$0xf]  ;;  %2881 = vmatpush3.bf16.msra.mxu0 %v3364_v45 }
  0x26   : > { %v936_v46 = vsel %vm909_vm0, %v930_v25, %v935_v34  ;;  %v939_v47 = vor.u32 %v938_v36, %v937_v35  ;;  %v627_v48 = vor.u32 %v626_v37, %v622_v19  ;;  %v387_v49 = vmax.bf16 %v3439_v9, %v330_v16  ;;  %v340_v35 = vld [vmem:[%s3507_s6 + $0x58] sm:$0xf]  ;;  %v341_v36 = vld [vmem:[%s3507_s6 + $0x5c] sm:$0x3]  ;;  %2882 = vmatprep.subr.bf16.mxu0 %v3367_v4 }
  0x27   : > { %1085 = vrot.lane.b32.xlu0 %v936_v46, %s3440_s9  ;;  %817 = vrot.lane.b32.xlu1 %v620_v40, %s3440_s9  ;;  %v944_v51 = vor.u32 %v943_v42, %v942_v41  ;;  %v388_v52 = vmax.bf16 %v3439_v9, %v331_v21  ;;  %v389_v53 = vmax.bf16 %v3439_v9, %v332_v24  ;;  %v348_v45 = vld [vmem:[%s3507_s6 + $0x78] sm:$0xf] }
  0x28   : > { %v632_v54 = vsel %vm584_vm1, %v627_v48, %v631_v43  ;;  %v390_v55 = vmax.bf16 %v3439_v9, %v333_v31  ;;  %v391_v56 = vmax.bf16 %v3439_v9, %v334_v32  ;;  %v392_v57 = vmax.bf16 %v3439_v9, %v335_v33 }
  0x29   : > { %v945_v58 = vsel %vm909_vm0, %v939_v47, %v944_v51  ;;  %v3609_v61 = vcombine.low %v387_v49, %v388_v52  ;;  %v3611_v62 = vcombine.low %v389_v53, %v389_v53  ;;  %v393_v63 = vmax.bf16 %v3439_v9, %v336_v38  ;;  %v3365_v51 = vld [vmem:[%s4539_s2 + $0x58] sm:$0xff]  }
  0x2a   : > { %v3614_v0 = vcombine.low %v390_v55, %v391_v56  ;;  %v3616_v1 = vcombine.low %v392_v57, %v392_v57  ;;  %v394_v2 = vmax.bf16 %v3439_v9, %v337_v44  ;;  %v395_v3 = vmax.bf16 %v3439_v9, %v338_v50  ;;  %v342_v50 = vld [vmem:[%s3507_s6 + $0x60] sm:$0xf]  ;;  %v3366_v56 = vld [vmem:[%s4539_s2 + $0x18] sm:$0xff]   ;;  %2992 = vmatprep.subr.bf16.mxu1 %v3365_v51 }
  0x2b   : > { %1087 = vrot.lane.b32.xlu0 %v945_v58, %s3440_s9  ;;  %819 = vrot.lane.b32.xlu1 %v632_v54, %s3440_s9  ;;  %v634_v5 = vshrl.u32 %v3609_v61, 16  ;;  %v636_v6 = vshll.u32 %v3609_v61, 16  ;;  %v641_v7 = vshll.u32 %v3611_v62, 16  ;;  %v949_v11 = vshrl.u32 %v3611_v62, 16 }
  0x2c   : > { %v646_v14 = vshrl.u32 %v3614_v0, 16  ;;  %v648_v15 = vshll.u32 %v3614_v0, 16  ;;  %v653_v16 = vshll.u32 %v3616_v1, 16  ;;  %v958_v17 = vshrl.u32 %v3616_v1, 16  ;;  %2993 = vmatpush3.bf16.msra.mxu1 %v3366_v56 }
  0x2d   : > { %v946_v18 = vrot.slane %v634_v5, 1  ;;  %v947_v19 = vrot.slane %v636_v6, 2  ;;  %v951_v20 = vrot.slane %v949_v11, 1  ;;  %v952_v21 = vrot.slane %v641_v7, 2 }
  0x2e   : > { %v638_v24 = vrot.slane %v636_v6, 1  ;;  %v643_v25 = vrot.slane %v641_v7, 1  ;;  %v955_v26 = vrot.slane %v646_v14, 1  ;;  %v956_v29 = vrot.slane %v648_v15, 2 }
  0x2f   : > { %v948_v31 = vor.u32 %v947_v19, %v946_v18  ;;  %v953_v32 = vor.u32 %v952_v21, %v951_v20  ;;  %v960_v33 = vrot.slane %v958_v17, 1  ;;  %v961_v34 = vrot.slane %v653_v16, 2  ;;  %v3368_v17 = vld [vmem:[%s4539_s2 + $0xa0] sm:$0xff]  }
  0x30   : > { %v639_v37 = vor.u32 %v638_v24, %v634_v5  ;;  %v957_v38 = vor.u32 %v956_v29, %v955_v26  ;;  %v650_v39 = vrot.slane %v648_v15, 1  ;;  %v655_v40 = vrot.slane %v653_v16, 1  ;;  %v344_v16 = vld [vmem:[%s3507_s6 + $0x68] sm:$0x3]  ;;  %v345_v24 = vld [vmem:[%s3507_s6 + $0x6c] sm:$0xf]  ;;  %2883 = vmatpush3.bf16.msra.mxu0 %v3368_v17 }
  0x31   : > { %v954_v41 = vsel %vm909_vm0, %v948_v31, %v953_v32  ;;  %v962_v42 = vor.u32 %v961_v34, %v960_v33  ;;  %v3643_v43 = vcombine.low %v393_v63, %v394_v2  ;;  %v3645_v44 = vcombine.low %v395_v3, %v395_v3  ;;  %v343_v3 = vld [vmem:[%s3507_s6 + $0x64] sm:$0xf]  ;;  %v347_v33 = vld [vmem:[%s3507_s6 + $0x74] sm:$0x3]  ;;  %v3374_v17 = vld [vmem:[%s4539_s2 + $0x28] sm:$0xff]  }
  0x32   : > { %1089 = vrot.lane.b32.xlu0 %v954_v41, %s3440_s9  ;;  %v644_v46 = vsel %vm584_vm1, %v639_v37, %v643_v25  ;;  %v651_v47 = vor.u32 %v650_v39, %v646_v14  ;;  %v396_v48 = vmax.bf16 %v3439_v9, %v339_v30  ;;  %v397_v49 = vmax.bf16 %v3439_v9, %v340_v35  ;;  %v346_v25 = vld [vmem:[%s3507_s6 + $0x70] sm:$0xf]  ;;  %v3369_v26 = vld [vmem:[%s4539_s2 + $0x60] sm:$0xff]  }
  0x33   : > { %821 = vrot.lane.b32.xlu1 %v644_v46, %s3440_s9  ;;  %v963_v52 = vsel %vm909_vm0, %v957_v38, %v962_v42  ;;  %v658_v53 = vshrl.u32 %v3643_v43, 16  ;;  %v660_v54 = vshll.u32 %v3643_v43, 16  ;;  %v665_v55 = vshll.u32 %v3645_v44, 16  ;;  %v3370_v34 = vld [vmem:[%s4539_s2 + $0x20] sm:$0xff]   ;;  %2994 = vmatprep.subr.bf16.mxu1 %v3369_v26  ;;  %v3371_v46 = vld [vmem:[%s4539_s2 + $0xe8] sm:$0xff]  }
  0x34   : > { %v656_v57 = vsel %vm584_vm1, %v651_v47, %v655_v40  ;;  %v967_v58 = vshrl.u32 %v3645_v44, 16  ;;  %v398_v63 = vmax.bf16 %v3439_v9, %v341_v36  ;;  %v3669_v2 = vcombine.low %v396_v48, %v397_v49  ;;  %2995 = vmatpush3.bf16.msra.mxu1 %v3370_v34  ;;  %2884 = vmatprep.subr.bf16.mxu0 %v3371_v46  ;;  %v3377_v46 = vld [vmem:[%s4539_s2 + $0x70] sm:$0xff]  }
  0x35   : > { %v964_v5 = vrot.slane %v658_v53, 1  ;;  %v965_v6 = vrot.slane %v660_v54, 2  ;;  %v970_v7 = vrot.slane %v665_v55, 2  ;;  %v662_v11 = vrot.slane %v660_v54, 1 }
  0x36   : > { %1091 = vrot.lane.b32.xlu0 %v963_v52, %s3440_s9  ;;  %v969_v12 = vrot.slane %v967_v58, 1  ;;  %v667_v13 = vrot.slane %v665_v55, 1  ;;  %v3676_v14 = vcombine.low %v398_v63, %v398_v63  ;;  %v670_v15 = vshrl.u32 %v3669_v2, 16  ;;  %v3372_v55 = vld [vmem:[%s4539_s2 + $0xa8] sm:$0xff]  }
  0x37   : > { %823 = vrot.lane.b32.xlu1 %v656_v57, %s3440_s9  ;;  %v966_v18 = vor.u32 %v965_v6, %v964_v5  ;;  %v663_v19 = vor.u32 %v662_v11, %v658_v53  ;;  %v672_v20 = vshll.u32 %v3669_v2, 16  ;;  %v399_v21 = vmax.bf16 %v3439_v9, %v342_v50  ;;  %v349_v50 = vld [vmem:[%s3507_s6 + $0x7c] sm:$0xf]  ;;  %2885 = vmatpush3.bf16.msra.mxu0 %v3372_v55 }
  0x38   : > { %v971_v29 = vor.u32 %v970_v7, %v969_v12  ;;  %v677_v30 = vshll.u32 %v3676_v14, 16  ;;  %v973_v31 = vrot.slane %v670_v15, 1  ;;  %v976_v32 = vshrl.u32 %v3676_v14, 16 }
  0x39   : > { %v668_v35 = vsel %vm584_vm1, %v663_v19, %v667_v13  ;;  %v974_v36 = vrot.slane %v672_v20, 2  ;;  %v674_v37 = vrot.slane %v672_v20, 1  ;;  %v400_v38 = vmax.bf16 %v3439_v9, %v343_v3  ;;  %v3373_v3 = vld [vmem:[%s4539_s2 + $0x68] sm:$0xff]  }
  0x3a   : > { %v972_v39 = vsel %vm909_vm0, %v966_v18, %v971_v29  ;;  %v978_v40 = vrot.slane %v976_v32, 1  ;;  %v979_v41 = vrot.slane %v677_v30, 2  ;;  %v679_v42 = vrot.slane %v677_v30, 1  ;;  %2996 = vmatprep.subr.bf16.mxu1 %v3373_v3  ;;  %v351_v30 = vld [vmem:[%s3507_s6 + $0x84] sm:$0xf]  ;;  %v3375_v32 = vld [vmem:[%s4539_s2 + $0xf0] sm:$0xff]  }
  0x3b   : > { %1093 = vrot.lane.b32.xlu0 %v972_v39, %s3440_s9  ;;  %825 = vrot.lane.b32.xlu1 %v668_v35, %s3440_s9  ;;  %v975_v47 = vor.u32 %v974_v36, %v973_v31  ;;  %v675_v48 = vor.u32 %v674_v37, %v670_v15  ;;  %v401_v49 = vmax.bf16 %v3439_v9, %v344_v16  ;;  %v350_v15 = vld [vmem:[%s3507_s6 + $0x80] sm:$0x3]  ;;  %v352_v31 = vld [vmem:[%s3507_s6 + $0x88] sm:$0xf] }
  0x3c   : > { %v980_v51 = vor.u32 %v979_v41, %v978_v40  ;;  %v3708_v52 = vcombine.low %v399_v21, %v400_v38  ;;  %v402_v53 = vmax.bf16 %v3439_v9, %v345_v24  ;;  %v403_v54 = vmax.bf16 %v3439_v9, %v346_v25  ;;  %2997 = vmatpush3.bf16.msra.mxu1 %v3374_v17  ;;  %v353_v38 = vld [vmem:[%s3507_s6 + $0x8c] sm:$0x3]  ;;  %v354_v39 = vld [vmem:[%s3507_s6 + $0x90] sm:$0xf] }
  0x3d   : > { %v680_v56 = vsel %vm584_vm1, %v675_v48, %v679_v42  ;;  %v3716_v57 = vcombine.low %v401_v49, %v401_v49  ;;  %v404_v58 = vmax.bf16 %v3439_v9, %v347_v33  ;;  %v405_v63 = vmax.bf16 %v3439_v9, %v348_v45  ;;  %v3376_v33 = vld [vmem:[%s4539_s2 + $0xb0] sm:$0xff]   ;;  %2886 = vmatprep.subr.bf16.mxu0 %v3375_v32 }
  0x3e   : > { %v981_v4 = vsel %vm909_vm0, %v975_v47, %v980_v51  ;;  %v682_v5 = vshrl.u32 %v3708_v52, 16  ;;  %v684_v6 = vshll.u32 %v3708_v52, 16  ;;  %v3726_v7 = vcombine.low %v402_v53, %v403_v54  ;;  %2887 = vmatpush3.bf16.msra.mxu0 %v3376_v33  ;;  %2998 = vmatprep.subr.bf16.mxu1 %v3377_v46 }
  0x3f   : > { %1095 = vrot.lane.b32.xlu0 %v981_v4, %s3440_s9  ;;  %827 = vrot.lane.b32.xlu1 %v680_v56, %s3440_s9  ;;  %v689_v11 = vshll.u32 %v3716_v57, 16  ;;  %v985_v12 = vshrl.u32 %v3716_v57, 16  ;;  %v3732_v13 = vcombine.low %v404_v58, %v404_v58  ;;  %v406_v16 = vmax.bf16 %v3439_v9, %v349_v50  ;;  %v3378_v56 = vld [vmem:[%s4539_s2 + $0x30] sm:$0xff]  }
  0x40   : > { %v982_v18 = vrot.slane %v682_v5, 1  ;;  %v983_v19 = vrot.slane %v684_v6, 2  ;;  %v686_v20 = vrot.slane %v684_v6, 1  ;;  %v694_v21 = vshrl.u32 %v3726_v7, 16  ;;  %v355_v6 = vld [vmem:[%s3507_s6 + $0x94] sm:$0xf]  ;;  %2999 = vmatpush3.bf16.msra.mxu1 %v3378_v56 }
  0x41   : > { %v987_v24 = vrot.slane %v985_v12, 1  ;;  %v988_v25 = vrot.slane %v689_v11, 2  ;;  %v691_v26 = vrot.slane %v689_v11, 1  ;;  %v696_v29 = vshll.u32 %v3726_v7, 16  ;;  %v3379_v11 = vld [vmem:[%s4539_s2 + $0xf8] sm:$0xff]   ;;  %v3383_v56 = vld [vmem:[%s4539_s2 + $0x140] sm:$0xff]  }
  0x42   : > { %v984_v34 = vor.u32 %v983_v19, %v982_v18  ;;  %v687_v35 = vor.u32 %v686_v20, %v682_v5  ;;  %v701_v36 = vshll.u32 %v3732_v13, 16  ;;  %v991_v37 = vrot.slane %v694_v21, 1  ;;  %2888 = vmatprep.subr.bf16.mxu0 %v3379_v11 }
  0x43   : > { %v989_v40 = vor.u32 %v988_v25, %v987_v24  ;;  %v992_v41 = vrot.slane %v696_v29, 2  ;;  %v994_v42 = vshrl.u32 %v3732_v13, 16  ;;  %v698_v45 = vrot.slane %v696_v29, 1  ;;  %v3380_v29 = vld [vmem:[%s4539_s2 + $0xb8] sm:$0xff]  }
  0x44   : > { %v692_v47 = vsel %vm584_vm1, %v687_v35, %v691_v26  ;;  %v997_v48 = vrot.slane %v701_v36, 2  ;;  %v703_v49 = vrot.slane %v701_v36, 1  ;;  %v407_v50 = vmax.bf16 %v3439_v9, %v350_v15  ;;  %v3381_v35 = vld [vmem:[%s4539_s2 + $0x78] sm:$0xff]   ;;  %2889 = vmatpush3.bf16.msra.mxu0 %v3380_v29 }
  0x45   : > { %v990_v51 = vsel %vm909_vm0, %v984_v34, %v989_v40  ;;  %829 = vrot.lane.b32.xlu1 %v692_v47, %s3440_s9  ;;  %v993_v53 = vor.u32 %v992_v41, %v991_v37  ;;  %v996_v54 = vrot.slane %v994_v42, 1  ;;  %v699_v55 = vor.u32 %v698_v45, %v694_v21  ;;  %v356_v34 = vld [vmem:[%s3507_s6 + $0x98] sm:$0x3]  ;;  %v357_v41 = vld [vmem:[%s3507_s6 + $0x9c] sm:$0xf]  ;;  %3000 = vmatprep.subr.bf16.mxu1 %v3381_v35 }
  0x46   : > { %1097 = vrot.lane.b32.xlu0 %v990_v51, %s3440_s9  ;;  %v3764_v58 = vcombine.low %v405_v63, %v406_v16  ;;  %v3766_v3 = vcombine.low %v407_v50, %v407_v50  ;;  %v408_v4 = vmax.bf16 %v3439_v9, %v351_v30  ;;  %v409_v5 = vmax.bf16 %v3439_v9, %v352_v31  ;;  %v3382_v36 = vld [vmem:[%s4539_s2 + $0x38] sm:$0xff]   ;;  %v358_v42 = vld [vmem:[%s3507_s6 + $0xa0] sm:$0xf]  ;;  %v360_v50 = vld [vmem:[%s3507_s6 + $0xa8] sm:$0xf] }
  0x47   : > { %v998_v12 = vor.u32 %v997_v48, %v996_v54  ;;  %v704_v15 = vsel %vm584_vm1, %v699_v55, %v703_v49  ;;  %v410_v17 = vmax.bf16 %v3439_v9, %v353_v38  ;;  %v411_v18 = vmax.bf16 %v3439_v9, %v354_v39  ;;  %v359_v49 = vld [vmem:[%s3507_s6 + $0xa4] sm:$0x3]  ;;  %3001 = vmatpush3.bf16.msra.mxu1 %v3382_v36 }
  0x48   : > { %v706_v63 = vshrl.u32 %v3764_v58, 16  ;;  %v708_v16 = vshll.u32 %v3764_v58, 16  ;;  %v713_v19 = vshll.u32 %v3766_v3, 16  ;;  %v1003_v20 = vshrl.u32 %v3766_v3, 16  ;;  %3098 = vmatprep.subr.bf16.mxu0 %v3383_v56 }
  0x49   : > { %v999_v21 = vsel %vm909_vm0, %v993_v53, %v998_v12  ;;  %831 = vrot.lane.b32.xlu1 %v704_v15, %s3440_s9  ;;  %v3783_v24 = vcombine.low %v408_v4, %v409_v5  ;;  %v3785_v25 = vcombine.low %v410_v17, %v410_v17  ;;  %v412_v26 = vmax.bf16 %v3439_v9, %v355_v6  ;;  %v361_v12 = vld [vmem:[%s3507_s6 + $0xac] sm:$0xf] }
  0x4a   : > { %1099 = vrot.lane.b32.xlu0 %v999_v21, %s3440_s9  ;;  %v1000_v30 = vrot.slane %v706_v63, 1  ;;  %v1001_v31 = vrot.slane %v708_v16, 2  ;;  %v1005_v32 = vrot.slane %v1003_v20, 1  ;;  %v1006_v33 = vrot.slane %v713_v19, 2 }
  0x4b   : > { %v710_v37 = vrot.slane %v708_v16, 1  ;;  %v715_v38 = vrot.slane %v713_v19, 1  ;;  %v718_v39 = vshrl.u32 %v3783_v24, 16  ;;  %v720_v40 = vshll.u32 %v3783_v24, 16 }
  0x4c   : > { %v1002_v45 = vor.u32 %v1001_v31, %v1000_v30  ;;  %v1007_v46 = vor.u32 %v1006_v33, %v1005_v32  ;;  %v725_v47 = vshll.u32 %v3785_v25, 16  ;;  %v1012_v48 = vshrl.u32 %v3785_v25, 16  ;;  %v3385_v30 = vld [vmem:[%s4539_s2 + $0x1c0] sm:$0xff]  }
  0x4d   : > { %v711_v51 = vor.u32 %v710_v37, %v706_v63  ;;  %v1009_v53 = vrot.slane %v718_v39, 1  ;;  %v1010_v54 = vrot.slane %v720_v40, 2  ;;  %v722_v55 = vrot.slane %v720_v40, 1  ;;  %3210 = vmatprep.subr.bf16.mxu1 %v3385_v30  ;;  %v362_v40 = vld [vmem:[%s3507_s6 + $0xb0] sm:$0x3] }
  0x4e   : > { %v1008_v4 = vsel %vm909_vm0, %v1002_v45, %v1007_v46  ;;  %v1014_v5 = vrot.slane %v1012_v48, 1  ;;  %v1015_v6 = vrot.slane %v725_v47, 2  ;;  %v727_v11 = vrot.slane %v725_v47, 1 }
  0x4f   : > { %1101 = vrot.lane.b32.xlu0 %v1008_v4, %s3440_s9  ;;  %v716_v15 = vsel %vm584_vm1, %v711_v51, %v715_v38  ;;  %v1011_v17 = vor.u32 %v1010_v54, %v1009_v53  ;;  %v723_v63 = vor.u32 %v722_v55, %v718_v39  ;;  %v413_v16 = vmax.bf16 %v3439_v9, %v356_v34  ;;  %v363_v53 = vld [vmem:[%s3507_s6 + $0xb4] sm:$0xf]  ;;  %v364_v54 = vld [vmem:[%s3507_s6 + $0xb8] sm:$0xf] }
  0x50   : > { %833 = vrot.lane.b32.xlu1 %v716_v15, %s3440_s9  ;;  %v1016_v19 = vor.u32 %v1015_v6, %v1014_v5  ;;  %v3816_v20 = vcombine.low %v411_v18, %v412_v26  ;;  %v414_v21 = vmax.bf16 %v3439_v9, %v357_v41  ;;  %v415_v29 = vmax.bf16 %v3439_v9, %v358_v42 }
  0x51   : > { %v728_v31 = vsel %vm584_vm1, %v723_v63, %v727_v11  ;;  %v3824_v32 = vcombine.low %v413_v16, %v413_v16  ;;  %v416_v33 = vmax.bf16 %v3439_v9, %v359_v49  ;;  %v417_v34 = vmax.bf16 %v3439_v9, %v360_v50 }
  0x52   : > { %v1017_v18 = vsel %vm909_vm0, %v1011_v17, %v1016_v19  ;;  %v730_v26 = vshrl.u32 %v3816_v20, 16  ;;  %v732_v35 = vshll.u32 %v3816_v20, 16  ;;  %v3831_v36 = vcombine.low %v414_v21, %v415_v29  ;;  %v365_v21 = vld [vmem:[%s3507_s6 + $0xbc] sm:$0x3] }
  0x53   : > { %1103 = vrot.lane.b32.xlu0 %v1017_v18, %s3440_s9  ;;  %v737_v37 = vshll.u32 %v3824_v32, 16  ;;  %v1021_v38 = vshrl.u32 %v3824_v32, 16  ;;  %v3836_v39 = vcombine.low %v416_v33, %v416_v33  ;;  %v418_v41 = vmax.bf16 %v3439_v9, %v361_v12 }
  0x54   : > { %835 = vrot.lane.b32.xlu1 %v728_v31, %s3440_s9  ;;  %v1018_v42 = vrot.slane %v730_v26, 1  ;;  %v1019_v45 = vrot.slane %v732_v35, 2  ;;  %v734_v46 = vrot.slane %v732_v35, 1  ;;  %v742_v47 = vshrl.u32 %v3831_v36, 16 }
  0x55   : > { %v1023_v48 = vrot.slane %v1021_v38, 1  ;;  %v1024_v49 = vrot.slane %v737_v37, 2  ;;  %v739_v50 = vrot.slane %v737_v37, 1  ;;  %v744_v51 = vshll.u32 %v3831_v36, 16 }
  0x56   : > { %v1020_v55 = vor.u32 %v1019_v45, %v1018_v42  ;;  %v735_v56 = vor.u32 %v734_v46, %v730_v26  ;;  %v749_v4 = vshll.u32 %v3836_v39, 16  ;;  %v1027_v5 = vrot.slane %v742_v47, 1 }
  0x57   : > { %v1025_v6 = vor.u32 %v1024_v49, %v1023_v48  ;;  %v1028_v11 = vrot.slane %v744_v51, 2  ;;  %v1030_v12 = vshrl.u32 %v3836_v39, 16  ;;  %v746_v15 = vrot.slane %v744_v51, 1 }
  0x58   : > { %v740_v17 = vsel %vm584_vm1, %v735_v56, %v739_v50  ;;  %v1033_v63 = vrot.slane %v749_v4, 2  ;;  %v751_v16 = vrot.slane %v749_v4, 1  ;;  %v419_v19 = vmax.bf16 %v3439_v9, %v362_v40 }
  0x59   : > { %v1026_v29 = vsel %vm909_vm0, %v1020_v55, %v1025_v6  ;;  %837 = vrot.lane.b32.xlu1 %v740_v17, %s3440_s9  ;;  %v1029_v30 = vor.u32 %v1028_v11, %v1027_v5  ;;  %v1032_v31 = vrot.slane %v1030_v12, 1  ;;  %v747_v33 = vor.u32 %v746_v15, %v742_v47  ;;  %v366_v6 = vld [vmem:[%s3870_s10] sm:$0xf]  ;;  %v367_v11 = vld [vmem:[%s3870_s10 + $0x4] sm:$0xf] }
  0x5a   : > { %1105 = vrot.lane.b32.xlu0 %v1026_v29, %s3440_s9  ;;  %v3855_v18 = vcombine.low %v417_v34, %v418_v41  ;;  %v3857_v26 = vcombine.low %v419_v19, %v419_v19  ;;  %v420_v35 = vmax.bf16 %v3439_v9, %v363_v53  ;;  %v421_v37 = vmax.bf16 %v3439_v9, %v364_v54  ;;  %v368_v12 = vld [vmem:[%s3870_s10 + $0x8] sm:$0x3] }
  0x5b   : > { %v1034_v38 = vor.u32 %v1033_v63, %v1032_v31  ;;  %v752_v40 = vsel %vm584_vm1, %v747_v33, %v751_v16  ;;  %v422_v42 = vmax.bf16 %v3439_v9, %v365_v21 }
  0x5c   : > { %v754_v45 = vshrl.u32 %v3855_v18, 16  ;;  %v756_v46 = vshll.u32 %v3855_v18, 16  ;;  %v761_v47 = vshll.u32 %v3857_v26, 16  ;;  %v1039_v34 = vshrl.u32 %v3857_v26, 16 }
  0x5d   : > { %v1035_v41 = vsel %vm909_vm0, %v1029_v30, %v1034_v38  ;;  %839 = vrot.lane.b32.xlu1 %v752_v40, %s3440_s9  ;;  %v3874_v48 = vcombine.low %v420_v35, %v421_v37  ;;  %v3876_v49 = vcombine.low %v422_v42, %v422_v42 }
  0x5e   : > { %1107 = vrot.lane.b32.xlu0 %v1035_v41, %s3440_s9  ;;  %v1036_v50 = vrot.slane %v754_v45, 1  ;;  %v1037_v51 = vrot.slane %v756_v46, 2  ;;  %v1041_v53 = vrot.slane %v1039_v34, 1  ;;  %v1042_v54 = vrot.slane %v761_v47, 2 }
  0x5f   : > { %v758_v55 = vrot.slane %v756_v46, 1  ;;  %v763_v56 = vrot.slane %v761_v47, 1  ;;  %v766_v4 = vshrl.u32 %v3874_v48, 16  ;;  %v768_v5 = vshll.u32 %v3874_v48, 16 }
  0x60   : > { %v1038_v15 = vor.u32 %v1037_v51, %v1036_v50  ;;  %v1043_v17 = vor.u32 %v1042_v54, %v1041_v53  ;;  %v773_v63 = vshll.u32 %v3876_v49, 16  ;;  %v1048_v16 = vshrl.u32 %v3876_v49, 16 }
  0x61   : > { %v759_v19 = vor.u32 %v758_v55, %v754_v45  ;;  %v1045_v21 = vrot.slane %v766_v4, 1  ;;  %v1046_v29 = vrot.slane %v768_v5, 2  ;;  %v770_v30 = vrot.slane %v768_v5, 1 }
  0x62   : > { %v1044_v31 = vsel %vm909_vm0, %v1038_v15, %v1043_v17  ;;  %v1050_v33 = vrot.slane %v1048_v16, 1  ;;  %v1051_v35 = vrot.slane %v773_v63, 2  ;;  %v775_v37 = vrot.slane %v773_v63, 1 }
  0x63   : > { %1109 = vrot.lane.b32.xlu0 %v1044_v31, %s3440_s9  ;;  %v764_v38 = vsel %vm584_vm1, %v759_v19, %v763_v56  ;;  %v1047_v40 = vor.u32 %v1046_v29, %v1045_v21  ;;  %v771_v42 = vor.u32 %v770_v30, %v766_v4  ;;  %v423_v47 = vmax.bf16 %v3439_v9, %v366_v6  ;;  %v369_v30 = vld [vmem:[%s3870_s10 + $0xc] sm:$0xf]  ;;  %v370_v31 = vld [vmem:[%s3870_s10 + $0x10] sm:$0xf] }
  0x64   : > { %841 = vrot.lane.b32.xlu1 %v764_v38, %s3440_s9  ;;  %v1052_v46 = vor.u32 %v1051_v35, %v1050_v33  ;;  %v424_v45 = vmax.bf16 %v3439_v9, %v367_v11  ;;  %v425_v34 = vmax.bf16 %v3439_v9, %v368_v12  ;;  %v371_v33 = vld [vmem:[%s3870_s10 + $0x14] sm:$0x3]  ;;  %v426_v35 = vmax.bf16 %v3439_v9, %v369_v30 }
  0x65   : > { %v776_v41 = vsel %vm584_vm1, %v771_v42, %v775_v37  ;;  %v427_v37 = vmax.bf16 %v3439_v9, %v370_v31  ;;  %v428_v38 = vmax.bf16 %v3439_v9, %v371_v33 }
  0x66   : > { %v1053_v50 = vsel %vm909_vm0, %v1047_v40, %v1052_v46  ;;  %v3895_v51 = vcombine.low %v423_v47, %v424_v45  ;;  %v3897_v53 = vcombine.low %v425_v34, %v425_v34  ;;  %v855_v46 = vrot.slane %v3527_v22, 1 }
  0x67   : > { %1111 = vrot.lane.b32.xlu0 %v1053_v50, %s3440_s9  ;;  %v3915_v40 = vcombine.low %v426_v35, %v427_v37  ;;  %v3917_v42 = vcombine.low %v428_v38, %v428_v38  ;;  %v856_v47 = vrot.slane %v3529_v23, 1  ;;  %v852_v45 = vrot.slane %v3534_v27, 1 }
  0x68   : > { %843 = vrot.lane.b32.xlu1 %v776_v41, %s3440_s9  ;;  %v778_v54 = vshrl.u32 %v3895_v51, 16  ;;  %v780_v55 = vshll.u32 %v3895_v51, 16  ;;  %v785_v56 = vshll.u32 %v3897_v53, 16  ;;  %v1057_v4 = vshrl.u32 %v3897_v53, 16 }
  0x69   : > { %v853_v34 = vrot.slane %v3536_v28, 1  ;;  %v790_v41 = vshrl.u32 %v3915_v40, 16  ;;  %v792_v50 = vshll.u32 %v3915_v40, 16  ;;  %v857_v23 = vsel %vm851_vm2, %v855_v46, %v856_v47  ;;  %v372_v28 = vld [vmem:[%s3870_s10 + $0x18] sm:$0xf] }
  0x6a   : > { %v1054_v5 = vrot.slane %v778_v54, 1  ;;  %v1055_v6 = vrot.slane %v780_v55, 2  ;;  %v1059_v11 = vrot.slane %v1057_v4, 1  ;;  %v1060_v12 = vrot.slane %v785_v56, 2 }
  0x6b   : > { %v782_v15 = vrot.slane %v780_v55, 1  ;;  %v787_v17 = vrot.slane %v785_v56, 1  ;;  %v1066_v55 = vshrl.u32 %v3917_v42, 16  ;;  %v1063_v56 = vrot.slane %v790_v41, 1 }
  0x6c   : > { %v1056_v63 = vor.u32 %v1055_v6, %v1054_v5  ;;  %v1061_v16 = vor.u32 %v1060_v12, %v1059_v11  ;;  %v1064_v4 = vrot.slane %v792_v50, 2  ;;  %v854_v11 = vsel %vm851_vm2, %v852_v45, %v853_v34 }
  0x6d   : > { %v783_v19 = vor.u32 %v782_v15, %v778_v54  ;;  %v797_v54 = vshll.u32 %v3917_v42, 16  ;;  %v1068_v5 = vrot.slane %v1066_v55, 1  ;;  %v794_v12 = vrot.slane %v792_v50, 1  ;;  %v373_v15 = vld [vmem:[%s3870_s10 + $0x1c] sm:$0xf] }
  0x6e   : > { %v1062_v21 = vsel %vm909_vm0, %v1056_v63, %v1061_v16  ;;  %v374_v16 = vld [vmem:[%s3870_s10 + $0x20] sm:$0x3]  ;;  %v859_v50 = vrot.slane %v3553_v60, 1  ;;  %v3387_v60 = vld [vmem:[%s4539_s2 + $0x148] sm:$0xff]  }
  0x6f   : > { %1113 = vrot.lane.b32.xlu0 %v1062_v21, %s3440_s9  ;;  %v788_v29 = vsel %vm584_vm1, %v783_v19, %v787_v17  ;;  %v1069_v6 = vrot.slane %v797_v54, 2  ;;  %v1065_v17 = vor.u32 %v1064_v4, %v1063_v56  ;;  %v429_v19 = vmax.bf16 %v3439_v9, %v372_v28  ;;  %v3386_v4 = vld [vmem:[%s4539_s2 + $0x180] sm:$0xff]  }
  0x70   : > { %845 = vrot.lane.b32.xlu1 %v788_v29, %s3440_s9  ;;  %v430_v21 = vmax.bf16 %v3439_v9, %v373_v15  ;;  %v795_v30 = vor.u32 %v794_v12, %v790_v41  ;;  %v799_v31 = vrot.slane %v797_v54, 1  ;;  %v431_v33 = vmax.bf16 %v3439_v9, %v374_v16  ;;  %v3384_v9 = vld [vmem:[%s4539_s2 + $0x100] sm:$0xff]   ;;  %v3389_v12 = vld [vmem:[%s4539_s2 + $0x1c8] sm:$0xff]  }
  0x71   : > { %v1070_v63 = vor.u32 %v1069_v6, %v1068_v5  ;;  %v858_v41 = vrot.slane %v3551_v59, 1 }
  0x72   : > { %v3937_v46 = vcombine.low %v429_v19, %v430_v21  ;;  %v800_v45 = vsel %vm584_vm1, %v795_v30, %v799_v31  ;;  %v3942_v34 = vcombine.low %v431_v33, %v431_v33  ;;  %v861_v21 = vrot.slane %v3569_v8, 1  ;;  %v3388_v30 = vld [vmem:[%s4539_s2 + $0x108] sm:$0xff]   ;;  %v3391_v33 = vld [vmem:[%s4539_s2 + $0x150] sm:$0xff]  }
  0x73   : > { %v1071_v38 = vsel %vm909_vm0, %v1065_v17, %v1070_v63 }
  0x74   : > { %1115 = vrot.lane.b32.xlu0 %v1071_v38, %s3440_s9  ;;  %847 = vrot.lane.b32.xlu1 %v800_v45, %s3440_s9  ;;  %v802_v54 = vshrl.u32 %v3937_v46, 16  ;;  %v804_v55 = vshll.u32 %v3937_v46, 16  ;;  %v809_v5 = vshll.u32 %v3942_v34, 16  ;;  %v1075_v6 = vshrl.u32 %v3942_v34, 16 }
  0x76   : > { %v1072_v28 = vrot.slane %v802_v54, 1  ;;  %v1073_v15 = vrot.slane %v804_v55, 2  ;;  %v1077_v63 = vrot.slane %v1075_v6, 1  ;;  %v1078_v16 = vrot.slane %v809_v5, 2 }
  0x77   : > { %v806_v19 = vrot.slane %v804_v55, 1 }
  0x78   : > { %v1074_v31 = vor.u32 %v1073_v15, %v1072_v28  ;;  %v3396_v15 = vld [vmem:[%s4539_s2 + $0x118] sm:$0xff]  }
  0x79   : > { %v807_v38 = vor.u32 %v806_v19, %v802_v54 }
  0x90   : > { %v1084_v29 = vpop.permute.xlu0 %1083 }
  0x91   : > { %v1082_v35 = vpop.permute.xlu1 %1081  ;;  %v1183_v37 = vsel %vm1119_vm3, %v857_v23, %v1084_v29  ;;  %v862_v29 = vrot.slane %v3571_v10, 1 }
  0x92   : > { %1446 = vmatprep.mubr.bf16.mxu0 %v1183_v37  ;;  %v1179_v47 = vsel %vm1119_vm3, %v854_v11, %v1082_v35  ;;  %v1079_v35 = vor.u32 %v1078_v16, %v1077_v63  ;;  %v3401_v63 = vld [vmem:[%s4539_s2 + $0x1e0] sm:$0xff]  }
  0x93   : > { %1703 = vmatprep.mubr.bf16.mxu1 %v1179_v47  ;;  %v811_v47 = vrot.slane %v809_v5, 1  ;;  %v863_v54 = vsel %vm851_vm2, %v861_v21, %v862_v29  ;;  %v3394_v5 = vld [vmem:[%s4539_s2 + $0x190] sm:$0xff]   ;;  %v867_v29 = vrot.slane %v3614_v0, 1 }
  0x94   : > { %v816_v56 = vpop.permute.xlu0 %815 }
  0x95   : > { %v814_v23 = vpop.permute.xlu1 %813  ;;  %v1124_v11 = vsel %vm1119_vm3, %v3527_v22, %v816_v56  ;;  %v860_v22 = vsel %vm851_vm2, %v858_v41, %v859_v50  ;;  %v1080_v41 = vsel %vm909_vm0, %v1074_v31, %v1079_v35  ;;  %v812_v55 = vsel %vm584_vm1, %v807_v38, %v811_v47  ;;  %v3392_v56 = vld [vmem:[%s4539_s2 + $0x110] sm:$0xff]   ;;  %v3403_v31 = vld [vmem:[%s4539_s2 + $0x168] sm:$0xff]  }
  0x96   : > { %1447 = vmatmul.mubr.bf16.vlgmr.msra.gmra.mrb[0].mxu0 %v1124_v11  ;;  %v1121_v17 = vsel %vm1119_vm3, %v3534_v27, %v814_v23  ;;  %v3390_v27 = vld [vmem:[%s4539_s2 + $0x188] sm:$0xff]   ;;  %1117 = vrot.lane.b32.xlu0 %v1080_v41, %s3440_s9  ;;  %v864_v23 = vrot.slane %v3609_v61, 1 }
  0x97   : > { %1704 = vmatmul.mubr.bf16.vlgmr.msra.gmra.mrb[0].mxu1 %v1121_v17  ;;  %3099 = vmatpush3.bf16.msra.mxu0 %v3384_v9  ;;  %v3406_v47 = vld [vmem:[%s4539_s2 + $0x1a8] sm:$0xff]  }
  0x98   : > { %1711 = vmatprep.mubr.bf16.mxu1 %v1183_v37  ;;  %3211 = vmatpush3.bf16.msra.mxu1 %v3386_v4  ;;  %v3393_v37 = vld [vmem:[%s4539_s2 + $0x1d0] sm:$0xff]  }
  0x99   : > { %v1086_v45 = vpop.permute.xlu0 %1085  ;;  %v818_v10 = vpop.permute.xlu1 %817  ;;  %3100 = vmatprep.subr.bf16.mxu0 %v3387_v60  ;;  %3212 = vmatprep.subr.bf16.mxu1 %v3389_v12  ;;  %v865_v60 = vrot.slane %v3611_v62, 1  ;;  %v3397_v12 = vld [vmem:[%s4539_s2 + $0x1d8] sm:$0xff]  }
  0x9a   : > { %v3983_v9 = vsel %vm1119_vm3, %v860_v22, %v1086_v45  ;;  %v3989_v50 = vsel %vm1119_vm3, %v3551_v59, %v818_v10  ;;  %v3395_v59 = vld [vmem:[%s4539_s2 + $0x158] sm:$0xff]   ;;  %849 = vrot.lane.b32.xlu1 %v812_v55, %s3440_s9  ;;  %v3400_v22 = vld [vmem:[%s4539_s2 + $0x120] sm:$0xff]   ;;  %v3407_v45 = vld [vmem:[%s4539_s2 + $0x170] sm:$0xff]   ;;  %v870_v55 = vrot.slane %v3643_v43, 1 }
  0x9b   : > { %1454 = vmatprep.mubr.bf16.mxu0 %v3983_v9  ;;  %3101 = vmatpush3.bf16.msra.mxu0 %v3388_v30  ;;  %v3398_v62 = vld [vmem:[%s4539_s2 + $0x198] sm:$0xff]   ;;  %v866_v17 = vsel %vm851_vm2, %v864_v23, %v865_v60  ;;  %v868_v30 = vrot.slane %v3616_v1, 1  ;;  %v3409_v10 = vld [vmem:[%s4539_s2 + $0x1f0] sm:$0xff]  }
  0x9c   : > { %3213 = vmatpush3.bf16.msra.mxu1 %v3390_v27  ;;  %3102 = vmatprep.subr.bf16.mxu0 %v3391_v33  ;;  %v3405_v27 = vld [vmem:[%s4539_s2 + $0x1e8] sm:$0xff]  }
  0x9d   : > { %v1088_v4 = vpop.permute.xlu0 %1087  ;;  %3214 = vmatprep.subr.bf16.mxu1 %v3393_v37  ;;  %v820_v28 = vpop.permute.xlu1 %819  ;;  %v3404_v33 = vld [vmem:[%s4539_s2 + $0x128] sm:$0xff]   ;;  %v869_v35 = vsel %vm851_vm2, %v867_v29, %v868_v30  ;;  %v877_v29 = vrot.slane %v3716_v57, 1  ;;  %v879_v57 = vrot.slane %v3726_v7, 1 }
  0x9e   : > { %1455 = vmatmul.mubr.bf16.gmra.mrb[4].mxu0 %v3989_v50  ;;  %v4005_v6 = vsel %vm1119_vm3, %v863_v54, %v1088_v4  ;;  %v4030_v16 = vsel %vm1119_vm3, %v3569_v8, %v820_v28  ;;  %v3402_v8 = vld [vmem:[%s4539_s2 + $0x1a0] sm:$0xff]   ;;  %v3408_v54 = vld [vmem:[%s4539_s2 + $0x130] sm:$0xff]  }
  0x9f   : > { %1712 = vmatmul.mubr.bf16.gmra.mrb[4].mxu1 %v1124_v11  ;;  %1462 = vmatprep.mubr.bf16.mxu0 %v4005_v6  ;;  %v3399_v11 = vld [vmem:[%s4539_s2 + $0x160] sm:$0xff]   ;;  %v3410_v4 = vld [vmem:[%s4539_s2 + $0x1b0] sm:$0xff]  }
  0xa0   : > { %1719 = vmatprep.mubr.bf16.mxu1 %v3983_v9  ;;  %3103 = vmatpush3.bf16.msra.mxu0 %v3392_v56  ;;  %v871_v56 = vrot.slane %v3645_v44, 1 }
  0xa1   : > { %3215 = vmatpush3.bf16.msra.mxu1 %v3394_v5  ;;  %3104 = vmatprep.subr.bf16.mxu0 %v3395_v59  ;;  %v3413_v5 = vld [vmem:[%s4539_s2 + $0x1f8] sm:$0xff]  }
  0xa2   : > { %3216 = vmatprep.subr.bf16.mxu1 %v3397_v12  ;;  %v3412_v59 = vld [vmem:[%s4539_s2 + $0x138] sm:$0xff]   ;;  %v872_v23 = vsel %vm851_vm2, %v870_v55, %v871_v56 }
  0xa3   : > { %v3414_v12 = vld [vmem:[%s4539_s2 + $0x1b8] sm:$0xff]  }
  0xa4   : > { %v1090_v19 = vpop.permute.xlu0 %1089  ;;  %3105 = vmatpush3.bf16.msra.mxu0 %v3396_v15 }
  0xa5   : > { %v4036_v21 = vsel %vm1119_vm3, %v866_v17, %v1090_v19  ;;  %3217 = vmatpush3.bf16.msra.mxu1 %v3398_v62  ;;  %3106 = vmatprep.subr.bf16.mxu0 %v3399_v11  ;;  %v822_v1 = vpop.permute.xlu1 %821  ;;  %v873_v62 = vrot.slane %v3669_v2, 1  ;;  %v874_v11 = vrot.slane %v3676_v14, 1  ;;  %v876_v14 = vrot.slane %v3708_v52, 1 }
  0xa6   : > { %1463 = vmatmul.mubr.bf16.gmra.mrb[8].mxu0 %v4030_v16  ;;  %3218 = vmatprep.subr.bf16.mxu1 %v3401_v63  ;;  %v4068_v37 = vsel %vm1119_vm3, %v3609_v61, %v822_v1  ;;  %v3411_v61 = vld [vmem:[%s4539_s2 + $0x178] sm:$0xff]   ;;  %v880_v1 = vrot.slane %v3732_v13, 1  ;;  %v882_v13 = vrot.slane %v3764_v58, 1 }
  0xa7   : > { %1720 = vmatmul.mubr.bf16.gmra.mrb[8].mxu1 %v3989_v50  ;;  %1470 = vmatprep.mubr.bf16.mxu0 %v4036_v21 }
  0xa8   : > { %1727 = vmatprep.mubr.bf16.mxu1 %v4005_v6  ;;  %3107 = vmatpush3.bf16.msra.mxu0 %v3400_v22  ;;  %v1092_v38 = vpop.permute.xlu0 %1091 }
  0xa9   : > { %3219 = vmatpush3.bf16.msra.mxu1 %v3402_v8  ;;  %3108 = vmatprep.subr.bf16.mxu0 %v3403_v31  ;;  %v4071_v41 = vsel %vm1119_vm3, %v869_v35, %v1092_v38  ;;  %v824_v44 = vpop.permute.xlu1 %823  ;;  %v878_v8 = vsel %vm851_vm2, %v876_v14, %v877_v29  ;;  %v881_v35 = vsel %vm851_vm2, %v879_v57, %v880_v1 }
  0xaa   : > { %3220 = vmatprep.subr.bf16.mxu1 %v3405_v27  ;;  %v4100_v28 = vsel %vm1119_vm3, %v3614_v0, %v824_v44  ;;  %v875_v0 = vsel %vm851_vm2, %v873_v62, %v874_v11 }
  0xac   : > { %3109 = vmatpush3.bf16.msra.mxu0 %v3404_v33 }
  0xad   : > { %3221 = vmatpush3.bf16.msra.mxu1 %v3406_v47  ;;  %3110 = vmatprep.subr.bf16.mxu0 %v3407_v45  ;;  %v1094_v60 = vpop.permute.xlu0 %1093  ;;  %v826_v17 = vpop.permute.xlu1 %825  ;;  %v883_v45 = vrot.slane %v3766_v3, 1  ;;  %v885_v3 = vrot.slane %v3783_v24, 1 }
  0xae   : > { %1471 = vmatmul.mubr.bf16.gmra.mrb[12].mxu0 %v4068_v37  ;;  %3222 = vmatprep.subr.bf16.mxu1 %v3409_v10  ;;  %v4103_v15 = vsel %vm1119_vm3, %v872_v23, %v1094_v60  ;;  %v4114_v19 = vsel %vm1119_vm3, %v3643_v43, %v826_v17  ;;  %v889_v23 = vrot.slane %v3824_v32, 1  ;;  %v891_v32 = vrot.slane %v3831_v36, 1 }
  0xaf   : > { %1728 = vmatmul.mubr.bf16.gmra.mrb[12].mxu1 %v4030_v16  ;;  %1478 = vmatprep.mubr.bf16.mxu0 %v4071_v41  ;;  %v892_v17 = vrot.slane %v3836_v39, 1  ;;  %v894_v39 = vrot.slane %v3855_v18, 1 }
  0xb0   : > { %1735 = vmatprep.mubr.bf16.mxu1 %v4036_v21  ;;  %3111 = vmatpush3.bf16.msra.mxu0 %v3408_v54  ;;  %v884_v54 = vsel %vm851_vm2, %v882_v13, %v883_v45 }
  0xb1   : > { %3223 = vmatpush3.bf16.msra.mxu1 %v3410_v4  ;;  %3112 = vmatprep.subr.bf16.mxu0 %v3411_v61  ;;  %v1096_v63 = vpop.permute.xlu0 %1095  ;;  %v828_v30 = vpop.permute.xlu1 %827  ;;  %v886_v4 = vrot.slane %v3785_v25, 1  ;;  %v888_v25 = vrot.slane %v3816_v20, 1 }
  0xb2   : > { %3224 = vmatprep.subr.bf16.mxu1 %v3413_v5  ;;  %v4117_v22 = vsel %vm1119_vm3, %v875_v0, %v1096_v63  ;;  %v4128_v31 = vsel %vm1119_vm3, %v3669_v2, %v828_v30  ;;  %v893_v63 = vsel %vm851_vm2, %v891_v32, %v892_v17  ;;  %v895_v30 = vrot.slane %v3857_v26, 1 }
  0xb3   : > { %v887_v5 = vsel %vm851_vm2, %v885_v3, %v886_v4  ;;  %v897_v26 = vrot.slane %v3874_v48, 1 }
  0xb4   : > { %3113 = vmatpush3.bf16.msra.mxu0 %v3412_v59 }
  0xb5   : > { %3225 = vmatpush3.bf16.msra.mxu1 %v3414_v12  ;;  %v890_v12 = vsel %vm851_vm2, %v888_v25, %v889_v23 }
  0xb6   : > { %1479 = vmatmul.mubr.bf16.gmra.mrb[16].mxu0 %v4100_v28 }
  0xb7   : > { %1736 = vmatmul.mubr.bf16.gmra.mrb[16].mxu1 %v4068_v37  ;;  %1486 = vmatprep.mubr.bf16.mxu0 %v4103_v15  ;;  %v830_v33 = vpop.permute.xlu1 %829 }
  0xb8   : > { %1743 = vmatprep.mubr.bf16.mxu1 %v4071_v41  ;;  %v1098_v43 = vpop.permute.xlu0 %1097  ;;  %v4142_v38 = vsel %vm1119_vm3, %v3708_v52, %v830_v33  ;;  %v898_v33 = vrot.slane %v3876_v49, 1  ;;  %v900_v49 = vrot.slane %v3895_v51, 1 }
  0xb9   : > { %v4131_v27 = vsel %vm1119_vm3, %v878_v8, %v1098_v43  ;;  %v896_v43 = vsel %vm851_vm2, %v894_v39, %v895_v30 }
  0xbb   : > { %v832_v10 = vpop.permute.xlu1 %831 }
  0xbc   : > { %v1100_v2 = vpop.permute.xlu0 %1099  ;;  %v4156_v55 = vsel %vm1119_vm3, %v3726_v7, %v832_v10  ;;  %v901_v10 = vrot.slane %v3897_v53, 1 }
  0xbd   : > { %v4145_v47 = vsel %vm1119_vm3, %v881_v35, %v1100_v2  ;;  %v899_v2 = vsel %vm851_vm2, %v897_v26, %v898_v33  ;;  %v906_v33 = vrot.slane %v3937_v46, 1 }
  0xbe   : > { %1487 = vmatmul.mubr.bf16.gmra.mrb[20].mxu0 %v4114_v19 }
  0xbf   : > { %1744 = vmatmul.mubr.bf16.gmra.mrb[20].mxu1 %v4100_v28  ;;  %1494 = vmatprep.mubr.bf16.mxu0 %v4117_v22 }
  0xc0   : > { %1751 = vmatprep.mubr.bf16.mxu1 %v4103_v15 }
  0xc1   : > { %v1102_v52 = vpop.permute.xlu0 %1101 }
  0xc2   : > { %v4159_v56 = vsel %vm1119_vm3, %v884_v54, %v1102_v52  ;;  %v834_v61 = vpop.permute.xlu1 %833 }
  0xc3   : > { %v4170_v44 = vsel %vm1119_vm3, %v3764_v58, %v834_v61 }
  0xc5   : > { %v1104_v7 = vpop.permute.xlu0 %1103 }
  0xc6   : > { %1495 = vmatmul.mubr.bf16.gmra.mrb[24].mxu0 %v4128_v31  ;;  %v4173_v59 = vsel %vm1119_vm3, %v887_v5, %v1104_v7  ;;  %v836_v60 = vpop.permute.xlu1 %835 }
  0xc7   : > { %1752 = vmatmul.mubr.bf16.gmra.mrb[24].mxu1 %v4114_v19  ;;  %1502 = vmatprep.mubr.bf16.mxu0 %v4131_v27  ;;  %v4184_v62 = vsel %vm1119_vm3, %v3783_v24, %v836_v60 }
  0xc8   : > { %1759 = vmatprep.mubr.bf16.mxu1 %v4117_v22 }
  0xcb   : > { %v838_v0 = vpop.permute.xlu1 %837 }
  0xcc   : > { %v1106_v58 = vpop.permute.xlu0 %1105  ;;  %v4198_v14 = vsel %vm1119_vm3, %v3816_v20, %v838_v0 }
  0xcd   : > { %v4187_v11 = vsel %vm1119_vm3, %v890_v12, %v1106_v58  ;;  %v903_v58 = vrot.slane %v3915_v40, 1 }
  0xce   : > { %1503 = vmatmul.mubr.bf16.gmra.mrb[28].mxu0 %v4142_v38 }
  0xcf   : > { %1760 = vmatmul.mubr.bf16.gmra.mrb[28].mxu1 %v4128_v31  ;;  %1510 = vmatprep.mubr.bf16.mxu0 %v4145_v47  ;;  %v840_v8 = vpop.permute.xlu1 %839 }
  0xd0   : > { %1767 = vmatprep.mubr.bf16.mxu1 %v4131_v27  ;;  %v1108_v24 = vpop.permute.xlu0 %1107  ;;  %v4212_v57 = vsel %vm1119_vm3, %v3831_v36, %v840_v8 }
  0xd1   : > { %v4201_v29 = vsel %vm1119_vm3, %v893_v63, %v1108_v24 }
  0xd5   : > { %v1110_v20 = vpop.permute.xlu0 %1109 }
  0xd6   : > { %1511 = vmatmul.mubr.bf16.gmra.mrb[32].mxu0 %v4156_v55  ;;  %v4215_v1 = vsel %vm1119_vm3, %v896_v43, %v1110_v20  ;;  %v842_v35 = vpop.permute.xlu1 %841 }
  0xd7   : > { %1768 = vmatmul.mubr.bf16.gmra.mrb[32].mxu1 %v4142_v38  ;;  %1518 = vmatprep.mubr.bf16.mxu0 %v4159_v56  ;;  %v4226_v13 = vsel %vm1119_vm3, %v3855_v18, %v842_v35  ;;  %v902_v18 = vsel %vm851_vm2, %v900_v49, %v901_v10  ;;  %v907_v35 = vrot.slane %v3942_v34, 1 }
  0xd8   : > { %1775 = vmatprep.mubr.bf16.mxu1 %v4145_v47 }
  0xd9   : > { %v1112_v36 = vpop.permute.xlu0 %1111 }
  0xda   : > { %v4229_v45 = vsel %vm1119_vm3, %v899_v2, %v1112_v36  ;;  %v844_v54 = vpop.permute.xlu1 %843 }
  0xdb   : > { %v4240_v3 = vsel %vm1119_vm3, %v3874_v48, %v844_v54  ;;  %v908_v54 = vsel %vm851_vm2, %v906_v33, %v907_v35 }
  0xde   : > { %1519 = vmatmul.mubr.bf16.gmra.mrb[36].mxu0 %v4170_v44 }
  0xdf   : > { %1776 = vmatmul.mubr.bf16.gmra.mrb[36].mxu1 %v4156_v55  ;;  %1526 = vmatprep.mubr.bf16.mxu0 %v4173_v59 }
  0xe0   : > { %1783 = vmatprep.mubr.bf16.mxu1 %v4159_v56 }
  0xe1   : > { %v1114_v52 = vpop.permute.xlu0 %1113 }
  0xe2   : > { %v4243_v4 = vsel %vm1119_vm3, %v902_v18, %v1114_v52  ;;  %v846_v53 = vpop.permute.xlu1 %845 }
  0xe3   : > { %v4251_v61 = vsel %vm1119_vm3, %v3895_v51, %v846_v53 }
  0xe6   : > { %1527 = vmatmul.mubr.bf16.gmra.mrb[40].mxu0 %v4184_v62  ;;  %v1116_v17 = vpop.permute.xlu0 %1115  ;;  %v848_v36 = vpop.permute.xlu1 %847 }
  0xe7   : > { %1784 = vmatmul.mubr.bf16.gmra.mrb[40].mxu1 %v4170_v44  ;;  %1534 = vmatprep.mubr.bf16.mxu0 %v4187_v11 }
  0xe8   : > { %1791 = vmatprep.mubr.bf16.mxu1 %v4173_v59 }
  0xee   : > { %1535 = vmatmul.mubr.bf16.gmra.mrb[44].mxu0 %v4198_v14 }
  0xef   : > { %1792 = vmatmul.mubr.bf16.gmra.mrb[44].mxu1 %v4184_v62  ;;  %1542 = vmatprep.mubr.bf16.mxu0 %v4201_v29 }
  0xf0   : > { %1799 = vmatprep.mubr.bf16.mxu1 %v4187_v11 }
  0xf6   : > { %1543 = vmatmul.mubr.bf16.gmra.mrb[48].mxu0 %v4212_v57 }
  0xf7   : > { %1800 = vmatmul.mubr.bf16.gmra.mrb[48].mxu1 %v4198_v14  ;;  %1550 = vmatprep.mubr.bf16.mxu0 %v4215_v1 }
  0xf8   : > { %1807 = vmatprep.mubr.bf16.mxu1 %v4201_v29 }
  0xfe   : > { %1551 = vmatmul.mubr.bf16.gmra.mrb[52].mxu0 %v4226_v13 }
  0xff   : > { %1808 = vmatmul.mubr.bf16.gmra.mrb[52].mxu1 %v4212_v57  ;;  %1558 = vmatprep.mubr.bf16.mxu0 %v4229_v45 }
 0x100   : > { %1815 = vmatprep.mubr.bf16.mxu1 %v4215_v1 }
 0x106   : > { %1559 = vmatmul.mubr.bf16.gmra.mrb[56].mxu0 %v4240_v3 }
 0x107   : > { %1816 = vmatmul.mubr.bf16.gmra.mrb[56].mxu1 %v4226_v13  ;;  %1566 = vmatprep.mubr.bf16.mxu0 %v4243_v4 }
 0x108   : > { %1823 = vmatprep.mubr.bf16.mxu1 %v4229_v45 }
 0x10e   : > { %1567 = vmatmul.mubr.bf16.gmra.mrb[60].mxu0 %v4251_v61 }
 0x10f   : > { %1824 = vmatmul.mubr.bf16.gmra.mrb[60].mxu1 %v4240_v3  ;;  %1993 = vmatprep.mubr.bf16.mxu0 %v3983_v9 }
 0x110   : > { %2315 = vmatprep.mubr.bf16.mxu1 %v4005_v6 }
 0x116   : > { %1994 = vmatmul.mubr.bf16.vlgmr.msra.gmra.mrb[64].mxu0 %v3989_v50 }
 0x117   : > { %2316 = vmatmul.mubr.bf16.vlgmr.msra.gmra.mrb[64].mxu1 %v4030_v16  ;;  %2001 = vmatprep.mubr.bf16.mxu0 %v4005_v6 }
 0x118   : > { %2323 = vmatprep.mubr.bf16.mxu1 %v4036_v21 }
 0x11e   : > { %2002 = vmatmul.mubr.bf16.gmra.mrb[68].mxu0 %v4030_v16 }
 0x11f   : > { %2324 = vmatmul.mubr.bf16.gmra.mrb[68].mxu1 %v4068_v37  ;;  %2009 = vmatprep.mubr.bf16.mxu0 %v4036_v21 }
 0x120   : > { %2331 = vmatprep.mubr.bf16.mxu1 %v4071_v41 }
 0x126   : > { %2010 = vmatmul.mubr.bf16.gmra.mrb[72].mxu0 %v4068_v37 }
 0x127   : > { %2332 = vmatmul.mubr.bf16.gmra.mrb[72].mxu1 %v4100_v28  ;;  %2017 = vmatprep.mubr.bf16.mxu0 %v4071_v41 }
 0x128   : > { %2339 = vmatprep.mubr.bf16.mxu1 %v4103_v15 }
 0x12e   : > { %2018 = vmatmul.mubr.bf16.gmra.mrb[76].mxu0 %v4100_v28 }
 0x12f   : > { %2340 = vmatmul.mubr.bf16.gmra.mrb[76].mxu1 %v4114_v19  ;;  %2025 = vmatprep.mubr.bf16.mxu0 %v4103_v15 }
 0x130   : > { %2347 = vmatprep.mubr.bf16.mxu1 %v4117_v22 }
 0x136   : > { %2026 = vmatmul.mubr.bf16.gmra.mrb[80].mxu0 %v4114_v19 }
 0x137   : > { %2348 = vmatmul.mubr.bf16.gmra.mrb[80].mxu1 %v4128_v31  ;;  %2033 = vmatprep.mubr.bf16.mxu0 %v4117_v22 }
 0x138   : > { %2355 = vmatprep.mubr.bf16.mxu1 %v4131_v27 }
 0x13e   : > { %2034 = vmatmul.mubr.bf16.gmra.mrb[84].mxu0 %v4128_v31 }
 0x13f   : > { %2356 = vmatmul.mubr.bf16.gmra.mrb[84].mxu1 %v4142_v38  ;;  %2041 = vmatprep.mubr.bf16.mxu0 %v4131_v27 }
 0x140   : > { %2363 = vmatprep.mubr.bf16.mxu1 %v4145_v47 }
 0x146   : > { %2042 = vmatmul.mubr.bf16.gmra.mrb[88].mxu0 %v4142_v38 }
 0x147   : > { %2364 = vmatmul.mubr.bf16.gmra.mrb[88].mxu1 %v4156_v55  ;;  %2049 = vmatprep.mubr.bf16.mxu0 %v4145_v47 }
 0x148   : > { %2371 = vmatprep.mubr.bf16.mxu1 %v4159_v56 }
 0x14e   : > { %2050 = vmatmul.mubr.bf16.gmra.mrb[92].mxu0 %v4156_v55 }
 0x14f   : > { %2372 = vmatmul.mubr.bf16.gmra.mrb[92].mxu1 %v4170_v44  ;;  %2057 = vmatprep.mubr.bf16.mxu0 %v4159_v56 }
 0x150   : > { %2379 = vmatprep.mubr.bf16.mxu1 %v4173_v59 }
 0x156   : > { %2058 = vmatmul.mubr.bf16.gmra.mrb[96].mxu0 %v4170_v44 }
 0x157   : > { %2380 = vmatmul.mubr.bf16.gmra.mrb[96].mxu1 %v4184_v62  ;;  %2065 = vmatprep.mubr.bf16.mxu0 %v4173_v59 }
 0x158   : > { %2387 = vmatprep.mubr.bf16.mxu1 %v4187_v11 }
 0x15e   : > { %2066 = vmatmul.mubr.bf16.gmra.mrb[100].mxu0 %v4184_v62  ;;  %v904_v62 = vrot.slane %v3917_v42, 1 }
 0x15f   : > { %2388 = vmatmul.mubr.bf16.gmra.mrb[100].mxu1 %v4198_v14  ;;  %2073 = vmatprep.mubr.bf16.mxu0 %v4187_v11 }
 0x160   : > { %2395 = vmatprep.mubr.bf16.mxu1 %v4201_v29  ;;  %v905_v24 = vsel %vm851_vm2, %v903_v58, %v904_v62 }
 0x166   : > { %2074 = vmatmul.mubr.bf16.gmra.mrb[104].mxu0 %v4198_v14 }
 0x167   : > { %2396 = vmatmul.mubr.bf16.gmra.mrb[104].mxu1 %v4212_v57  ;;  %2081 = vmatprep.mubr.bf16.mxu0 %v4201_v29 }
 0x168   : > { %2403 = vmatprep.mubr.bf16.mxu1 %v4215_v1 }
 0x169   : > { %v2890_v48 = vpop.f32.mrb[0].mxu0 }
 0x16a   : > { %v3002_v51 = vpop.f32.mrb[0].mxu1  ;;  %v2891_v9 = vpop.f32.mrb[1].mxu0 }
 0x16b   : > { %v2892_v50 = vadd.f32 %v2891_v9, %v2890_v48  ;;  %v3003_v6 = vpop.f32.mrb[1].mxu1  ;;  %v2893_v16 = vpop.f32.mrb[2].mxu0 }
 0x16c   : > { %v3004_v21 = vadd.f32 %v3003_v6, %v3002_v51  ;;  %v3005_v37 = vpop.f32.mrb[2].mxu1  ;;  %v2894_v41 = vpop.f32.mrb[3].mxu0  ;;  %v1172_v51 = vsel %vm1119_vm3, %v3915_v40, %v848_v36 }
 0x16d   : > { %v2895_v28 = vadd.f32 %v2894_v41, %v2893_v16  ;;  %v3006_v15 = vpop.f32.mrb[3].mxu1  ;;  %v850_v41 = vpop.permute.xlu1 %849 }
 0x16e   : > { %v4301_v19 = vadd.f32 %v3004_v21, %v2892_v50  ;;  %v3007_v22 = vadd.f32 %v3006_v15, %v3005_v37  ;;  %2082 = vmatmul.mubr.bf16.gmra.mrb[108].mxu0 %v4212_v57  ;;  %v1247_v57 = vsel %vm1119_vm3, %v905_v24, %v1116_v17 }
 0x16f   : > { %2404 = vmatmul.mubr.bf16.gmra.mrb[108].mxu1 %v4226_v13  ;;  %2089 = vmatprep.mubr.bf16.mxu0 %v4215_v1 }
 0x170   : > { %v4306_v31 = vadd.f32 %v3007_v22, %v2895_v28  ;;  %2411 = vmatprep.mubr.bf16.mxu1 %v4229_v45 }
 0x171   : > { %v2896_v27 = vpop.f32.mrb[4].mxu0 }
 0x172   : > { %v3008_v38 = vpop.f32.mrb[4].mxu1  ;;  %v2897_v47 = vpop.f32.mrb[5].mxu0 }
 0x173   : > { %v2898_v55 = vadd.f32 %v2897_v47, %v2896_v27  ;;  %v3009_v56 = vpop.f32.mrb[5].mxu1  ;;  %v2899_v5 = vpop.f32.mrb[6].mxu0 }
 0x174   : > { %v3010_v7 = vadd.f32 %v3009_v56, %v3008_v38  ;;  %v3011_v44 = vpop.f32.mrb[6].mxu1  ;;  %v2900_v59 = vpop.f32.mrb[7].mxu0  ;;  %v1175_v56 = vsel %vm1119_vm3, %v3937_v46, %v850_v41 }
 0x175   : > { %v2901_v25 = vadd.f32 %v2900_v59, %v2899_v5  ;;  %v3012_v23 = vpop.f32.mrb[7].mxu1 }
 0x176   : > { %v4309_v60 = vadd.f32 %v3010_v7, %v2898_v55  ;;  %v3013_v12 = vadd.f32 %v3012_v23, %v3011_v44  ;;  %2090 = vmatmul.mubr.bf16.gmra.mrb[112].mxu0 %v4226_v13 }
 0x177   : > { %2412 = vmatmul.mubr.bf16.gmra.mrb[112].mxu1 %v4240_v3  ;;  %2097 = vmatprep.mubr.bf16.mxu0 %v4229_v45  ;;  %v1118_v45 = vpop.permute.xlu0 %1117 }
 0x178   : > { %v4316_v11 = vadd.f32 %v3013_v12, %v2901_v25  ;;  %2419 = vmatprep.mubr.bf16.mxu1 %v4243_v4  ;;  %v1251_v50 = vsel %vm1119_vm3, %v908_v54, %v1118_v45 }
 0x179   : > { %v2902_v32 = vpop.f32.mrb[8].mxu0 }
 0x17a   : > { %v3014_v0 = vpop.f32.mrb[8].mxu1  ;;  %v2903_v63 = vpop.f32.mrb[9].mxu0 }
 0x17b   : > { %v2904_v14 = vadd.f32 %v2903_v63, %v2902_v32  ;;  %v3015_v29 = vpop.f32.mrb[9].mxu1  ;;  %v2905_v39 = vpop.f32.mrb[10].mxu0 }
 0x17c   : > { %v3016_v30 = vadd.f32 %v3015_v29, %v3014_v0  ;;  %v3017_v8 = vpop.f32.mrb[10].mxu1  ;;  %v2906_v42 = vpop.f32.mrb[11].mxu0 }
 0x17d   : > { %v2907_v43 = vadd.f32 %v2906_v42, %v2905_v39  ;;  %v3018_v20 = vpop.f32.mrb[11].mxu1 }
 0x17e   : > { %v4321_v1 = vadd.f32 %v3016_v30, %v2904_v14  ;;  %v3019_v26 = vadd.f32 %v3018_v20, %v3017_v8  ;;  %2098 = vmatmul.mubr.bf16.gmra.mrb[116].mxu0 %v4240_v3 }
 0x17f   : > { %2420 = vmatmul.mubr.bf16.gmra.mrb[116].mxu1 %v4251_v61  ;;  %2105 = vmatprep.mubr.bf16.mxu0 %v4243_v4 }
 0x180   : > { %v4328_v2 = vadd.f32 %v3019_v26, %v2907_v43  ;;  %2427 = vmatprep.mubr.bf16.mxu1 %v1247_v57 }
 0x181   : > { %v2908_v13 = vpop.f32.mrb[12].mxu0 }
 0x182   : > { %v3020_v49 = vpop.f32.mrb[12].mxu1  ;;  %v2909_v10 = vpop.f32.mrb[13].mxu0 }
 0x183   : > { %v2910_v52 = vadd.f32 %v2909_v10, %v2908_v13  ;;  %v3021_v18 = vpop.f32.mrb[13].mxu1  ;;  %v2911_v3 = vpop.f32.mrb[14].mxu0 }
 0x184   : > { %v3022_v53 = vadd.f32 %v3021_v18, %v3020_v49  ;;  %v3023_v48 = vpop.f32.mrb[14].mxu1  ;;  %v2912_v34 = vpop.f32.mrb[15].mxu0 }
 0x185   : > { %v2913_v4 = vadd.f32 %v2912_v34, %v2911_v3  ;;  %v3024_v9 = vpop.f32.mrb[15].mxu1 }
 0x186   : > { %v4334_v6 = vadd.f32 %v3022_v53, %v2910_v52  ;;  %v3025_v16 = vadd.f32 %v3024_v9, %v3023_v48  ;;  %2106 = vmatmul.mubr.bf16.gmra.mrb[120].mxu0 %v4251_v61 }
 0x187   : > { %2428 = vmatmul.mubr.bf16.gmra.mrb[120].mxu1 %v1172_v51  ;;  %2113 = vmatprep.mubr.bf16.mxu0 %v1247_v57 }
 0x188   : > { %v4337_v21 = vadd.f32 %v3025_v16, %v2913_v4  ;;  %2435 = vmatprep.mubr.bf16.mxu1 %v1251_v50 }
 0x189   : > { %v2914_v37 = vpop.f32.mrb[16].mxu0 }
 0x18a   : > { %v3026_v28 = vpop.f32.mrb[16].mxu1  ;;  %v2915_v15 = vpop.f32.mrb[17].mxu0 }
 0x18b   : > { %v2916_v22 = vadd.f32 %v2915_v15, %v2914_v37  ;;  %v3027_v40 = vpop.f32.mrb[17].mxu1  ;;  %v2917_v27 = vpop.f32.mrb[18].mxu0 }
 0x18c   : > { %v3028_v38 = vadd.f32 %v3027_v40, %v3026_v28  ;;  %v3029_v47 = vpop.f32.mrb[18].mxu1  ;;  %v2918_v55 = vpop.f32.mrb[19].mxu0 }
 0x18d   : > { %v2919_v5 = vadd.f32 %v2918_v55, %v2917_v27  ;;  %v3030_v61 = vpop.f32.mrb[19].mxu1 }
 0x18e   : > { %v4341_v7 = vadd.f32 %v3028_v38, %v2916_v22  ;;  %v3031_v44 = vadd.f32 %v3030_v61, %v3029_v47  ;;  %2114 = vmatmul.mubr.bf16.gmra.mrb[124].mxu0 %v1172_v51 }
 0x18f   : > { %2436 = vmatmul.mubr.bf16.gmra.mrb[124].mxu1 %v1175_v56 }
 0x190   : > { %v4343_v59 = vadd.f32 %v3031_v44, %v2919_v5 }
 0x191   : > { %v2920_v25 = vpop.f32.mrb[20].mxu0 }
 0x192   : > { %v3032_v23 = vpop.f32.mrb[20].mxu1  ;;  %v2921_v12 = vpop.f32.mrb[21].mxu0 }
 0x193   : > { %v2922_v58 = vadd.f32 %v2921_v12, %v2920_v25  ;;  %v3033_v62 = vpop.f32.mrb[21].mxu1  ;;  %v2923_v32 = vpop.f32.mrb[22].mxu0 }
 0x194   : > { %v3034_v17 = vadd.f32 %v3033_v62, %v3032_v23  ;;  %v3035_v0 = vpop.f32.mrb[22].mxu1  ;;  %v2924_v63 = vpop.f32.mrb[23].mxu0 }
 0x195   : > { %v2925_v24 = vadd.f32 %v2924_v63, %v2923_v32  ;;  %v3036_v46 = vpop.f32.mrb[23].mxu1 }
 0x196   : > { %v4345_v14 = vadd.f32 %v3034_v17, %v2922_v58  ;;  %v3037_v29 = vadd.f32 %v3036_v46, %v3035_v0 }
 0x198   : > { %v4347_v39 = vadd.f32 %v3037_v29, %v2925_v24 }
 0x199   : > { %v2926_v30 = vpop.f32.mrb[24].mxu0 }
 0x19a   : > { %v3038_v8 = vpop.f32.mrb[24].mxu1  ;;  %v2927_v42 = vpop.f32.mrb[25].mxu0 }
 0x19b   : > { %v2928_v43 = vadd.f32 %v2927_v42, %v2926_v30  ;;  %v3039_v20 = vpop.f32.mrb[25].mxu1  ;;  %v2929_v57 = vpop.f32.mrb[26].mxu0 }
 0x19c   : > { %v3040_v26 = vadd.f32 %v3039_v20, %v3038_v8  ;;  %v3041_v33 = vpop.f32.mrb[26].mxu1  ;;  %v2930_v35 = vpop.f32.mrb[27].mxu0 }
 0x19d   : > { %v2931_v36 = vadd.f32 %v2930_v35, %v2929_v57  ;;  %v3042_v13 = vpop.f32.mrb[27].mxu1 }
 0x19e   : > { %v4349_v45 = vadd.f32 %v3040_v26, %v2928_v43  ;;  %v3043_v49 = vadd.f32 %v3042_v13, %v3041_v33 }
 0x1a0   : > { %v4351_v10 = vadd.f32 %v3043_v49, %v2931_v36 }
 0x1a1   : > { %v2932_v54 = vpop.f32.mrb[28].mxu0 }
 0x1a2   : > { %v3044_v52 = vpop.f32.mrb[28].mxu1  ;;  %v2933_v18 = vpop.f32.mrb[29].mxu0 }
 0x1a3   : > { %v2934_v3 = vadd.f32 %v2933_v18, %v2932_v54  ;;  %v3045_v53 = vpop.f32.mrb[29].mxu1  ;;  %v2935_v48 = vpop.f32.mrb[30].mxu0 }
 0x1a4   : > { %v3046_v34 = vadd.f32 %v3045_v53, %v3044_v52  ;;  %v3047_v51 = vpop.f32.mrb[30].mxu1  ;;  %v2936_v4 = vpop.f32.mrb[31].mxu0 }
 0x1a5   : > { %v2937_v9 = vadd.f32 %v2936_v4, %v2935_v48  ;;  %v3048_v50 = vpop.f32.mrb[31].mxu1 }
 0x1a6   : > { %v4353_v16 = vadd.f32 %v3046_v34, %v2934_v3  ;;  %v3049_v37 = vadd.f32 %v3048_v50, %v3047_v51 }
 0x1a8   : > { %v4355_v41 = vadd.f32 %v3049_v37, %v2937_v9 }
 0x1a9   : > { %v2938_v28 = vpop.f32.mrb[32].mxu0 }
 0x1aa   : > { %v3050_v15 = vpop.f32.mrb[32].mxu1  ;;  %v2939_v22 = vpop.f32.mrb[33].mxu0 }
 0x1ab   : > { %v2940_v40 = vadd.f32 %v2939_v22, %v2938_v28  ;;  %v3051_v27 = vpop.f32.mrb[33].mxu1  ;;  %v2941_v38 = vpop.f32.mrb[34].mxu0 }
 0x1ac   : > { %v3052_v47 = vadd.f32 %v3051_v27, %v3050_v15  ;;  %v3053_v55 = vpop.f32.mrb[34].mxu1  ;;  %v2942_v56 = vpop.f32.mrb[35].mxu0 }
 0x1ad   : > { %v2943_v5 = vadd.f32 %v2942_v56, %v2941_v38  ;;  %v3054_v61 = vpop.f32.mrb[35].mxu1 }
 0x1ae   : > { %v4357_v44 = vadd.f32 %v3052_v47, %v2940_v40  ;;  %v3055_v25 = vadd.f32 %v3054_v61, %v3053_v55 }
 0x1b0   : > { %v4359_v23 = vadd.f32 %v3055_v25, %v2943_v5 }
 0x1b1   : > { %v2944_v12 = vpop.f32.mrb[36].mxu0 }
 0x1b2   : > { %v3056_v58 = vpop.f32.mrb[36].mxu1  ;;  %v2945_v62 = vpop.f32.mrb[37].mxu0 }
 0x1b3   : > { %v2946_v32 = vadd.f32 %v2945_v62, %v2944_v12  ;;  %v3057_v17 = vpop.f32.mrb[37].mxu1  ;;  %v2947_v0 = vpop.f32.mrb[38].mxu0 }
 0x1b4   : > { %v3058_v63 = vadd.f32 %v3057_v17, %v3056_v58  ;;  %v3059_v24 = vpop.f32.mrb[38].mxu1  ;;  %v2948_v46 = vpop.f32.mrb[39].mxu0 }
 0x1b5   : > { %v2949_v29 = vadd.f32 %v2948_v46, %v2947_v0  ;;  %v3060_v30 = vpop.f32.mrb[39].mxu1 }
 0x1b6   : > { %v4361_v8 = vadd.f32 %v3058_v63, %v2946_v32  ;;  %v3061_v42 = vadd.f32 %v3060_v30, %v3059_v24 }
 0x1b8   : > { %v4363_v43 = vadd.f32 %v3061_v42, %v2949_v29 }
 0x1b9   : > { %v2950_v20 = vpop.f32.mrb[40].mxu0 }
 0x1ba   : > { %v3062_v57 = vpop.f32.mrb[40].mxu1  ;;  %v2951_v26 = vpop.f32.mrb[41].mxu0 }
 0x1bb   : > { %v2952_v33 = vadd.f32 %v2951_v26, %v2950_v20  ;;  %v3063_v35 = vpop.f32.mrb[41].mxu1  ;;  %v2953_v36 = vpop.f32.mrb[42].mxu0 }
 0x1bc   : > { %v3064_v13 = vadd.f32 %v3063_v35, %v3062_v57  ;;  %v3065_v49 = vpop.f32.mrb[42].mxu1  ;;  %v2954_v54 = vpop.f32.mrb[43].mxu0 }
 0x1bd   : > { %v2955_v52 = vadd.f32 %v2954_v54, %v2953_v36  ;;  %v3066_v18 = vpop.f32.mrb[43].mxu1 }
 0x1be   : > { %v4365_v3 = vadd.f32 %v3064_v13, %v2952_v33  ;;  %v3067_v53 = vadd.f32 %v3066_v18, %v3065_v49 }
 0x1c0   : > { %v4367_v48 = vadd.f32 %v3067_v53, %v2955_v52 }
 0x1c1   : > { %v2956_v34 = vpop.f32.mrb[44].mxu0 }
 0x1c2   : > { %v3068_v51 = vpop.f32.mrb[44].mxu1  ;;  %v2957_v4 = vpop.f32.mrb[45].mxu0 }
 0x1c3   : > { %v2958_v9 = vadd.f32 %v2957_v4, %v2956_v34  ;;  %v3069_v50 = vpop.f32.mrb[45].mxu1  ;;  %v2959_v37 = vpop.f32.mrb[46].mxu0 }
 0x1c4   : > { %v3070_v28 = vadd.f32 %v3069_v50, %v3068_v51  ;;  %v3071_v15 = vpop.f32.mrb[46].mxu1  ;;  %v2960_v22 = vpop.f32.mrb[47].mxu0 }
 0x1c5   : > { %v2961_v40 = vadd.f32 %v2960_v22, %v2959_v37  ;;  %v3072_v27 = vpop.f32.mrb[47].mxu1 }
 0x1c6   : > { %v4369_v38 = vadd.f32 %v3070_v28, %v2958_v9  ;;  %v3073_v47 = vadd.f32 %v3072_v27, %v3071_v15 }
 0x1c8   : > { %v4371_v55 = vadd.f32 %v3073_v47, %v2961_v40 }
 0x1c9   : > { %v2962_v56 = vpop.f32.mrb[48].mxu0 }
 0x1ca   : > { %v3074_v5 = vpop.f32.mrb[48].mxu1  ;;  %v2963_v61 = vpop.f32.mrb[49].mxu0 }
 0x1cb   : > { %v2964_v25 = vadd.f32 %v2963_v61, %v2962_v56  ;;  %v3075_v12 = vpop.f32.mrb[49].mxu1  ;;  %v2965_v58 = vpop.f32.mrb[50].mxu0 }
 0x1cc   : > { %v3076_v62 = vadd.f32 %v3075_v12, %v3074_v5  ;;  %v3077_v32 = vpop.f32.mrb[50].mxu1  ;;  %v2966_v17 = vpop.f32.mrb[51].mxu0 }
 0x1cd   : > { %v2967_v0 = vadd.f32 %v2966_v17, %v2965_v58  ;;  %v3078_v63 = vpop.f32.mrb[51].mxu1 }
 0x1ce   : > { %v4373_v24 = vadd.f32 %v3076_v62, %v2964_v25  ;;  %v3079_v46 = vadd.f32 %v3078_v63, %v3077_v32 }
 0x1d0   : > { %v4375_v29 = vadd.f32 %v3079_v46, %v2967_v0 }
 0x1d1   : > { %v2968_v30 = vpop.f32.mrb[52].mxu0 }
 0x1d2   : > { %v3080_v42 = vpop.f32.mrb[52].mxu1  ;;  %v2969_v20 = vpop.f32.mrb[53].mxu0 }
 0x1d3   : > { %v2970_v57 = vadd.f32 %v2969_v20, %v2968_v30  ;;  %v3081_v26 = vpop.f32.mrb[53].mxu1  ;;  %v2971_v33 = vpop.f32.mrb[54].mxu0 }
 0x1d4   : > { %v3082_v35 = vadd.f32 %v3081_v26, %v3080_v42  ;;  %v3083_v36 = vpop.f32.mrb[54].mxu1  ;;  %v2972_v13 = vpop.f32.mrb[55].mxu0 }
 0x1d5   : > { %v2973_v49 = vadd.f32 %v2972_v13, %v2971_v33  ;;  %v3084_v54 = vpop.f32.mrb[55].mxu1 }
 0x1d6   : > { %v4377_v52 = vadd.f32 %v3082_v35, %v2970_v57  ;;  %v3085_v18 = vadd.f32 %v3084_v54, %v3083_v36 }
 0x1d8   : > { %v4379_v53 = vadd.f32 %v3085_v18, %v2973_v49 }
 0x1d9   : > { %v2974_v34 = vpop.f32.mrb[56].mxu0 }
 0x1da   : > { %v3086_v51 = vpop.f32.mrb[56].mxu1  ;;  %v2975_v4 = vpop.f32.mrb[57].mxu0 }
 0x1db   : > { %v2976_v9 = vadd.f32 %v2975_v4, %v2974_v34  ;;  %v3087_v50 = vpop.f32.mrb[57].mxu1  ;;  %v2977_v37 = vpop.f32.mrb[58].mxu0 }
 0x1dc   : > { %v3088_v28 = vadd.f32 %v3087_v50, %v3086_v51  ;;  %v3089_v15 = vpop.f32.mrb[58].mxu1  ;;  %v2978_v22 = vpop.f32.mrb[59].mxu0  ;;  %v4394_v50 = vld [vmem:[%s4540_s3] ss:$0 sm:$0xff] }
 0x1dd   : > { %v2979_v40 = vadd.f32 %v2978_v22, %v2977_v37  ;;  %v3090_v27 = vpop.f32.mrb[59].mxu1 }
 0x1de   : > { %v4381_v47 = vadd.f32 %v3088_v28, %v2976_v9  ;;  %v3091_v56 = vadd.f32 %v3090_v27, %v3089_v15 }
 0x1e0   : > { %v4383_v5 = vadd.f32 %v3091_v56, %v2979_v40 }
 0x1e1   : > { %v2980_v61 = vpop.f32.mrb[60].mxu0 }
 0x1e2   : > { %v3092_v25 = vpop.f32.mrb[60].mxu1  ;;  %v2981_v12 = vpop.f32.mrb[61].mxu0 }
 0x1e3   : > { %v2982_v58 = vadd.f32 %v2981_v12, %v2980_v61  ;;  %v3093_v62 = vpop.f32.mrb[61].mxu1  ;;  %v2983_v32 = vpop.f32.mrb[62].mxu0 }
 0x1e4   : > { %v3094_v17 = vadd.f32 %v3093_v62, %v3092_v25  ;;  %v3095_v0 = vpop.f32.mrb[62].mxu1  ;;  %v2984_v63 = vpop.f32.mrb[63].mxu0 }
 0x1e5   : > { %v2985_v46 = vadd.f32 %v2984_v63, %v2983_v32  ;;  %v3096_v30 = vpop.f32.mrb[63].mxu1 }
 0x1e6   : > { %v4385_v42 = vadd.f32 %v3094_v17, %v2982_v58  ;;  %v3097_v20 = vadd.f32 %v3096_v30, %v3095_v0 }
 0x1e8   : > { %v4387_v57 = vadd.f32 %v3097_v20, %v2985_v46 }
 0x1e9   : > { %v3114_v26 = vpop.f32.mrb[64].mxu0 }
 0x1ea   : > { %v3226_v33 = vpop.f32.mrb[64].mxu1  ;;  %v3115_v35 = vpop.f32.mrb[65].mxu0 }
 0x1eb   : > { %v3116_v36 = vadd.f32 %v3115_v35, %v3114_v26  ;;  %v3227_v13 = vpop.f32.mrb[65].mxu1  ;;  %v3117_v49 = vpop.f32.mrb[66].mxu0 }
 0x1ec   : > { %v3228_v54 = vadd.f32 %v3227_v13, %v3226_v33  ;;  %v3229_v18 = vpop.f32.mrb[66].mxu1  ;;  %v3118_v34 = vpop.f32.mrb[67].mxu0 }
 0x1ed   : > { %v2122_v51 = vadd.f32 %v3116_v36, %v4301_v19  ;;  %v3119_v4 = vadd.f32 %v3118_v34, %v3117_v49  ;;  %v3230_v9 = vpop.f32.mrb[67].mxu1 }
 0x1ee   : > { %v3231_v37 = vadd.f32 %v3230_v9, %v3229_v18 }
 0x1ef   : > { %v2444_v28 = vadd.f32 %v3228_v54, %v2122_v51  ;;  %v2123_v15 = vadd.f32 %v3119_v4, %v4306_v31 }
 0x1f1   : > { %v2483_v19 = vadd.f32 %v4394_v50, %v2444_v28  ;;  %v2445_v22 = vadd.f32 %v3231_v37, %v2123_v15  ;;  %v3120_v40 = vpop.f32.mrb[68].mxu0 }
 0x1f2   : > { %v3232_v27 = vpop.f32.mrb[68].mxu1  ;;  %v3121_v56 = vpop.f32.mrb[69].mxu0 }
 0x1f3   : > { %2516 = vst.msk [vmem:[%s4400_s11] sm:$0xff] %vm2515_vm4, %v2483_v19  ;;  %v2484_v61 = vadd.f32 %v4394_v50, %v2445_v22  ;;  %v3122_v25 = vadd.f32 %v3121_v56, %v3120_v40  ;;  %v3233_v31 = vpop.f32.mrb[69].mxu1  ;;  %v3123_v12 = vpop.f32.mrb[70].mxu0 }
 0x1f4   : > { %v3234_v58 = vadd.f32 %v3233_v31, %v3232_v27  ;;  %v3235_v62 = vpop.f32.mrb[70].mxu1  ;;  %v3124_v32 = vpop.f32.mrb[71].mxu0 }
 0x1f5   : > { %2517 = vst.msk [vmem:[%s4400_s11 + $0x8] sm:$0xff] %vm2515_vm4, %v2484_v61  ;;  %v2124_v17 = vadd.f32 %v3122_v25, %v4309_v60  ;;  %v3125_v0 = vadd.f32 %v3124_v32, %v3123_v12  ;;  %v3236_v63 = vpop.f32.mrb[71].mxu1 }
 0x1f6   : > { %v3237_v46 = vadd.f32 %v3236_v63, %v3235_v62 }
 0x1f7   : > { %v2446_v30 = vadd.f32 %v3234_v58, %v2124_v17  ;;  %v2125_v20 = vadd.f32 %v3125_v0, %v4316_v11 }
 0x1f9   : > { %v2485_v26 = vadd.f32 %v4394_v50, %v2446_v30  ;;  %v2447_v33 = vadd.f32 %v3237_v46, %v2125_v20  ;;  %v3126_v35 = vpop.f32.mrb[72].mxu0 }
 0x1fa   : > { %v3238_v36 = vpop.f32.mrb[72].mxu1  ;;  %v3127_v13 = vpop.f32.mrb[73].mxu0 }
 0x1fb   : > { %2518 = vst.msk [vmem:[%s4400_s11 + $0x10] sm:$0xff] %vm2515_vm4, %v2485_v26  ;;  %v2486_v49 = vadd.f32 %v4394_v50, %v2447_v33  ;;  %v3128_v54 = vadd.f32 %v3127_v13, %v3126_v35  ;;  %v3239_v18 = vpop.f32.mrb[73].mxu1  ;;  %v3129_v60 = vpop.f32.mrb[74].mxu0 }
 0x1fc   : > { %v3240_v34 = vadd.f32 %v3239_v18, %v3238_v36  ;;  %v3241_v51 = vpop.f32.mrb[74].mxu1  ;;  %v3130_v4 = vpop.f32.mrb[75].mxu0 }
 0x1fd   : > { %2519 = vst.msk [vmem:[%s4400_s11 + $0x18] sm:$0xff] %vm2515_vm4, %v2486_v49  ;;  %v2126_v11 = vadd.f32 %v3128_v54, %v4321_v1  ;;  %v3131_v9 = vadd.f32 %v3130_v4, %v3129_v60  ;;  %v3242_v37 = vpop.f32.mrb[75].mxu1 }
 0x1fe   : > { %v3243_v28 = vadd.f32 %v3242_v37, %v3241_v51 }
 0x1ff   : > { %v2448_v15 = vadd.f32 %v3240_v34, %v2126_v11  ;;  %v2127_v19 = vadd.f32 %v3131_v9, %v4328_v2 }
 0x201   : > { %v2487_v22 = vadd.f32 %v4394_v50, %v2448_v15  ;;  %v2449_v40 = vadd.f32 %v3243_v28, %v2127_v19  ;;  %v3132_v27 = vpop.f32.mrb[76].mxu0 }
 0x202   : > { %v3244_v56 = vpop.f32.mrb[76].mxu1  ;;  %v3133_v61 = vpop.f32.mrb[77].mxu0 }
 0x203   : > { %2520 = vst.msk [vmem:[%s4400_s11 + $0x20] sm:$0xff] %vm2515_vm4, %v2487_v22  ;;  %v2488_v25 = vadd.f32 %v4394_v50, %v2449_v40  ;;  %v3134_v31 = vadd.f32 %v3133_v61, %v3132_v27  ;;  %v3245_v12 = vpop.f32.mrb[77].mxu1  ;;  %v3135_v1 = vpop.f32.mrb[78].mxu0 }
 0x204   : > { %v3246_v58 = vadd.f32 %v3245_v12, %v3244_v56  ;;  %v3247_v62 = vpop.f32.mrb[78].mxu1  ;;  %v3136_v32 = vpop.f32.mrb[79].mxu0 }
 0x205   : > { %2521 = vst.msk [vmem:[%s4400_s11 + $0x28] sm:$0xff] %vm2515_vm4, %v2488_v25  ;;  %v2128_v2 = vadd.f32 %v3134_v31, %v4334_v6  ;;  %v3137_v17 = vadd.f32 %v3136_v32, %v3135_v1  ;;  %v3248_v0 = vpop.f32.mrb[79].mxu1 }
 0x206   : > { %v3249_v63 = vadd.f32 %v3248_v0, %v3247_v62 }
 0x207   : > { %v2450_v46 = vadd.f32 %v3246_v58, %v2128_v2  ;;  %v2129_v30 = vadd.f32 %v3137_v17, %v4337_v21 }
 0x209   : > { %v2489_v20 = vadd.f32 %v4394_v50, %v2450_v46  ;;  %v2451_v26 = vadd.f32 %v3249_v63, %v2129_v30  ;;  %v3138_v33 = vpop.f32.mrb[80].mxu0 }
 0x20a   : > { %v3250_v35 = vpop.f32.mrb[80].mxu1  ;;  %v3139_v36 = vpop.f32.mrb[81].mxu0 }
 0x20b   : > { %2522 = vst.msk [vmem:[%s4400_s11 + $0x30] sm:$0xff] %vm2515_vm4, %v2489_v20  ;;  %v2490_v13 = vadd.f32 %v4394_v50, %v2451_v26  ;;  %v3140_v49 = vadd.f32 %v3139_v36, %v3138_v33  ;;  %v3251_v54 = vpop.f32.mrb[81].mxu1  ;;  %v3141_v6 = vpop.f32.mrb[82].mxu0 }
 0x20c   : > { %v3252_v18 = vadd.f32 %v3251_v54, %v3250_v35  ;;  %v3253_v60 = vpop.f32.mrb[82].mxu1  ;;  %v3142_v34 = vpop.f32.mrb[83].mxu0 }
 0x20d   : > { %2523 = vst.msk [vmem:[%s4400_s11 + $0x38] sm:$0xff] %vm2515_vm4, %v2490_v13  ;;  %v2130_v21 = vadd.f32 %v3140_v49, %v4341_v7  ;;  %v3143_v51 = vadd.f32 %v3142_v34, %v3141_v6  ;;  %v3254_v4 = vpop.f32.mrb[83].mxu1 }
 0x20e   : > { %v3255_v11 = vadd.f32 %v3254_v4, %v3253_v60 }
 0x20f   : > { %v2452_v9 = vadd.f32 %v3252_v18, %v2130_v21  ;;  %v2131_v37 = vadd.f32 %v3143_v51, %v4343_v59 }
 0x211   : > { %v2491_v28 = vadd.f32 %v4394_v50, %v2452_v9  ;;  %v2453_v15 = vadd.f32 %v3255_v11, %v2131_v37  ;;  %v3144_v19 = vpop.f32.mrb[84].mxu0 }
 0x212   : > { %v3256_v22 = vpop.f32.mrb[84].mxu1  ;;  %v3145_v40 = vpop.f32.mrb[85].mxu0 }
 0x213   : > { %2524 = vst.msk [vmem:[%s4400_s11 + $0x40] sm:$0xff] %vm2515_vm4, %v2491_v28  ;;  %v2492_v27 = vadd.f32 %v4394_v50, %v2453_v15  ;;  %v3146_v56 = vadd.f32 %v3145_v40, %v3144_v19  ;;  %v3257_v61 = vpop.f32.mrb[85].mxu1  ;;  %v3147_v7 = vpop.f32.mrb[86].mxu0 }
 0x214   : > { %v3258_v25 = vadd.f32 %v3257_v61, %v3256_v22  ;;  %v3259_v31 = vpop.f32.mrb[86].mxu1  ;;  %v3148_v12 = vpop.f32.mrb[87].mxu0 }
 0x215   : > { %2525 = vst.msk [vmem:[%s4400_s11 + $0x48] sm:$0xff] %vm2515_vm4, %v2492_v27  ;;  %v2132_v59 = vadd.f32 %v3146_v56, %v4345_v14  ;;  %v3149_v1 = vadd.f32 %v3148_v12, %v3147_v7  ;;  %v3260_v58 = vpop.f32.mrb[87].mxu1 }
 0x216   : > { %v3261_v62 = vadd.f32 %v3260_v58, %v3259_v31 }
 0x217   : > { %v2454_v32 = vadd.f32 %v3258_v25, %v2132_v59  ;;  %v2133_v2 = vadd.f32 %v3149_v1, %v4347_v39 }
 0x219   : > { %v2493_v17 = vadd.f32 %v4394_v50, %v2454_v32  ;;  %v2455_v0 = vadd.f32 %v3261_v62, %v2133_v2  ;;  %v3150_v63 = vpop.f32.mrb[88].mxu0 }
 0x21a   : > { %v3262_v46 = vpop.f32.mrb[88].mxu1  ;;  %v3151_v30 = vpop.f32.mrb[89].mxu0 }
 0x21b   : > { %2526 = vst.msk [vmem:[%s4400_s11 + $0x50] sm:$0xff] %vm2515_vm4, %v2493_v17  ;;  %v2494_v20 = vadd.f32 %v4394_v50, %v2455_v0  ;;  %v3152_v26 = vadd.f32 %v3151_v30, %v3150_v63  ;;  %v3263_v33 = vpop.f32.mrb[89].mxu1  ;;  %v3153_v14 = vpop.f32.mrb[90].mxu0 }
 0x21c   : > { %v3264_v35 = vadd.f32 %v3263_v33, %v3262_v46  ;;  %v3265_v36 = vpop.f32.mrb[90].mxu1  ;;  %v3154_v13 = vpop.f32.mrb[91].mxu0 }
 0x21d   : > { %2527 = vst.msk [vmem:[%s4400_s11 + $0x58] sm:$0xff] %vm2515_vm4, %v2494_v20  ;;  %v2134_v39 = vadd.f32 %v3152_v26, %v4349_v45  ;;  %v3155_v49 = vadd.f32 %v3154_v13, %v3153_v14  ;;  %v3266_v54 = vpop.f32.mrb[91].mxu1 }
 0x21e   : > { %v3267_v6 = vadd.f32 %v3266_v54, %v3265_v36 }
 0x21f   : > { %v2456_v18 = vadd.f32 %v3264_v35, %v2134_v39  ;;  %v2135_v60 = vadd.f32 %v3155_v49, %v4351_v10 }
 0x221   : > { %v2495_v34 = vadd.f32 %v4394_v50, %v2456_v18  ;;  %v2457_v21 = vadd.f32 %v3267_v6, %v2135_v60  ;;  %v3156_v51 = vpop.f32.mrb[92].mxu0 }
 0x222   : > { %v3268_v4 = vpop.f32.mrb[92].mxu1  ;;  %v3157_v11 = vpop.f32.mrb[93].mxu0 }
 0x223   : > { %2528 = vst.msk [vmem:[%s4400_s11 + $0x60] sm:$0xff] %vm2515_vm4, %v2495_v34  ;;  %v2496_v9 = vadd.f32 %v4394_v50, %v2457_v21  ;;  %v3158_v37 = vadd.f32 %v3157_v11, %v3156_v51  ;;  %v3269_v28 = vpop.f32.mrb[93].mxu1  ;;  %v3159_v45 = vpop.f32.mrb[94].mxu0 }
 0x224   : > { %v3270_v15 = vadd.f32 %v3269_v28, %v3268_v4  ;;  %v3271_v19 = vpop.f32.mrb[94].mxu1  ;;  %v3160_v22 = vpop.f32.mrb[95].mxu0 }
 0x225   : > { %2529 = vst.msk [vmem:[%s4400_s11 + $0x68] sm:$0xff] %vm2515_vm4, %v2496_v9  ;;  %v2136_v10 = vadd.f32 %v3158_v37, %v4353_v16  ;;  %v3161_v40 = vadd.f32 %v3160_v22, %v3159_v45  ;;  %v3272_v27 = vpop.f32.mrb[95].mxu1 }
 0x226   : > { %v3273_v56 = vadd.f32 %v3272_v27, %v3271_v19 }
 0x227   : > { %v2458_v61 = vadd.f32 %v3270_v15, %v2136_v10  ;;  %v2137_v7 = vadd.f32 %v3161_v40, %v4355_v41 }
 0x229   : > { %v2497_v25 = vadd.f32 %v4394_v50, %v2458_v61  ;;  %v2459_v31 = vadd.f32 %v3273_v56, %v2137_v7  ;;  %v3162_v12 = vpop.f32.mrb[96].mxu0 }
 0x22a   : > { %v3274_v59 = vpop.f32.mrb[96].mxu1  ;;  %v3163_v1 = vpop.f32.mrb[97].mxu0 }
 0x22b   : > { %2530 = vst.msk [vmem:[%s4400_s11 + $0x70] sm:$0xff] %vm2515_vm4, %v2497_v25  ;;  %v2498_v58 = vadd.f32 %v4394_v50, %v2459_v31  ;;  %v3164_v62 = vadd.f32 %v3163_v1, %v3162_v12  ;;  %v3275_v32 = vpop.f32.mrb[97].mxu1  ;;  %v3165_v16 = vpop.f32.mrb[98].mxu0 }
 0x22c   : > { %v3276_v2 = vadd.f32 %v3275_v32, %v3274_v59  ;;  %v3277_v17 = vpop.f32.mrb[98].mxu1  ;;  %v3166_v0 = vpop.f32.mrb[99].mxu0 }
 0x22d   : > { %2531 = vst.msk [vmem:[%s4400_s11 + $0x78] sm:$0xff] %vm2515_vm4, %v2498_v58  ;;  %v2138_v41 = vadd.f32 %v3164_v62, %v4357_v44  ;;  %v3167_v63 = vadd.f32 %v3166_v0, %v3165_v16  ;;  %v3278_v46 = vpop.f32.mrb[99].mxu1 }
 0x22e   : > { %v3279_v30 = vadd.f32 %v3278_v46, %v3277_v17 }
 0x22f   : > { %v2460_v20 = vadd.f32 %v3276_v2, %v2138_v41  ;;  %v2139_v26 = vadd.f32 %v3167_v63, %v4359_v23 }
 0x231   : > { %v2499_v33 = vadd.f32 %v4394_v50, %v2460_v20  ;;  %v2461_v14 = vadd.f32 %v3279_v30, %v2139_v26  ;;  %v3168_v35 = vpop.f32.mrb[100].mxu0 }
 0x232   : > { %v3280_v36 = vpop.f32.mrb[100].mxu1  ;;  %v3169_v13 = vpop.f32.mrb[101].mxu0 }
 0x233   : > { %2532 = vst.msk [vmem:[%s4400_s11 + $0x80] sm:$0xff] %vm2515_vm4, %v2499_v33  ;;  %v2500_v39 = vadd.f32 %v4394_v50, %v2461_v14  ;;  %v3170_v49 = vadd.f32 %v3169_v13, %v3168_v35  ;;  %v3281_v54 = vpop.f32.mrb[101].mxu1  ;;  %v3171_v44 = vpop.f32.mrb[102].mxu0 }
 0x234   : > { %v3282_v6 = vadd.f32 %v3281_v54, %v3280_v36  ;;  %v3283_v18 = vpop.f32.mrb[102].mxu1  ;;  %v3172_v60 = vpop.f32.mrb[103].mxu0 }
 0x235   : > { %2533 = vst.msk [vmem:[%s4400_s11 + $0x88] sm:$0xff] %vm2515_vm4, %v2500_v39  ;;  %v2140_v23 = vadd.f32 %v3170_v49, %v4361_v8  ;;  %v3173_v34 = vadd.f32 %v3172_v60, %v3171_v44  ;;  %v3284_v21 = vpop.f32.mrb[103].mxu1 }
 0x236   : > { %v3285_v51 = vadd.f32 %v3284_v21, %v3283_v18 }
 0x237   : > { %v2462_v4 = vadd.f32 %v3282_v6, %v2140_v23  ;;  %v2141_v11 = vadd.f32 %v3173_v34, %v4363_v43 }
 0x239   : > { %v2501_v9 = vadd.f32 %v4394_v50, %v2462_v4  ;;  %v2463_v37 = vadd.f32 %v3285_v51, %v2141_v11  ;;  %v3174_v28 = vpop.f32.mrb[104].mxu0 }
 0x23a   : > { %v3286_v45 = vpop.f32.mrb[104].mxu1  ;;  %v3175_v15 = vpop.f32.mrb[105].mxu0 }
 0x23b   : > { %2534 = vst.msk [vmem:[%s4400_s11 + $0x90] sm:$0xff] %vm2515_vm4, %v2501_v9  ;;  %v2502_v19 = vadd.f32 %v4394_v50, %v2463_v37  ;;  %v3176_v22 = vadd.f32 %v3175_v15, %v3174_v28  ;;  %v3287_v10 = vpop.f32.mrb[105].mxu1  ;;  %v3177_v8 = vpop.f32.mrb[106].mxu0 }
 0x23c   : > { %v3288_v40 = vadd.f32 %v3287_v10, %v3286_v45  ;;  %v3289_v27 = vpop.f32.mrb[106].mxu1  ;;  %v3178_v56 = vpop.f32.mrb[107].mxu0 }
 0x23d   : > { %2535 = vst.msk [vmem:[%s4400_s11 + $0x98] sm:$0xff] %vm2515_vm4, %v2502_v19  ;;  %v2142_v43 = vadd.f32 %v3176_v22, %v4365_v3  ;;  %v3179_v61 = vadd.f32 %v3178_v56, %v3177_v8  ;;  %v3290_v7 = vpop.f32.mrb[107].mxu1 }
 0x23e   : > { %v3291_v25 = vadd.f32 %v3290_v7, %v3289_v27 }
 0x23f   : > { %v2464_v31 = vadd.f32 %v3288_v40, %v2142_v43  ;;  %v2143_v12 = vadd.f32 %v3179_v61, %v4367_v48 }
 0x241   : > { %v2503_v59 = vadd.f32 %v4394_v50, %v2464_v31  ;;  %v2465_v1 = vadd.f32 %v3291_v25, %v2143_v12  ;;  %v3180_v58 = vpop.f32.mrb[108].mxu0 }
 0x242   : > { %v3292_v62 = vpop.f32.mrb[108].mxu1  ;;  %v3181_v32 = vpop.f32.mrb[109].mxu0 }
 0x243   : > { %2536 = vst.msk [vmem:[%s4400_s11 + $0xa0] sm:$0xff] %vm2515_vm4, %v2503_v59  ;;  %v2504_v16 = vadd.f32 %v4394_v50, %v2465_v1  ;;  %v3182_v2 = vadd.f32 %v3181_v32, %v3180_v58  ;;  %v3293_v17 = vpop.f32.mrb[109].mxu1  ;;  %v3183_v3 = vpop.f32.mrb[110].mxu0 }
 0x244   : > { %v3294_v0 = vadd.f32 %v3293_v17, %v3292_v62  ;;  %v3295_v41 = vpop.f32.mrb[110].mxu1  ;;  %v3184_v63 = vpop.f32.mrb[111].mxu0 }
 0x245   : > { %2537 = vst.msk [vmem:[%s4400_s11 + $0xa8] sm:$0xff] %vm2515_vm4, %v2504_v16  ;;  %v2144_v48 = vadd.f32 %v3182_v2, %v4369_v38  ;;  %v3185_v46 = vadd.f32 %v3184_v63, %v3183_v3  ;;  %v3296_v30 = vpop.f32.mrb[111].mxu1 }
 0x246   : > { %v3297_v20 = vadd.f32 %v3296_v30, %v3295_v41 }
 0x247   : > { %v2466_v26 = vadd.f32 %v3294_v0, %v2144_v48  ;;  %v2145_v33 = vadd.f32 %v3185_v46, %v4371_v55 }
 0x249   : > { %v2505_v14 = vadd.f32 %v4394_v50, %v2466_v26  ;;  %v2467_v35 = vadd.f32 %v3297_v20, %v2145_v33  ;;  %v3186_v36 = vpop.f32.mrb[112].mxu0 }
 0x24a   : > { %v3298_v13 = vpop.f32.mrb[112].mxu1  ;;  %v3187_v39 = vpop.f32.mrb[113].mxu0 }
 0x24b   : > { %2538 = vst.msk [vmem:[%s4400_s11 + $0xb0] sm:$0xff] %vm2515_vm4, %v2505_v14  ;;  %v2506_v49 = vadd.f32 %v4394_v50, %v2467_v35  ;;  %v3188_v54 = vadd.f32 %v3187_v39, %v3186_v36  ;;  %v3299_v44 = vpop.f32.mrb[113].mxu1  ;;  %v3189_v38 = vpop.f32.mrb[114].mxu0 }
 0x24c   : > { %v3300_v6 = vadd.f32 %v3299_v44, %v3298_v13  ;;  %v3301_v18 = vpop.f32.mrb[114].mxu1  ;;  %v3190_v60 = vpop.f32.mrb[115].mxu0 }
 0x24d   : > { %2539 = vst.msk [vmem:[%s4400_s11 + $0xb8] sm:$0xff] %vm2515_vm4, %v2506_v49  ;;  %v2146_v55 = vadd.f32 %v3188_v54, %v4373_v24  ;;  %v3191_v23 = vadd.f32 %v3190_v60, %v3189_v38  ;;  %v3302_v34 = vpop.f32.mrb[115].mxu1 }
 0x24e   : > { %v3303_v21 = vadd.f32 %v3302_v34, %v3301_v18 }
 0x24f   : > { %v2468_v51 = vadd.f32 %v3300_v6, %v2146_v55  ;;  %v2147_v4 = vadd.f32 %v3191_v23, %v4375_v29 }
 0x251   : > { %v2507_v11 = vadd.f32 %v4394_v50, %v2468_v51  ;;  %v2469_v9 = vadd.f32 %v3303_v21, %v2147_v4  ;;  %v3192_v37 = vpop.f32.mrb[116].mxu0 }
 0x252   : > { %v3304_v28 = vpop.f32.mrb[116].mxu1  ;;  %v3193_v45 = vpop.f32.mrb[117].mxu0 }
 0x253   : > { %2540 = vst.msk [vmem:[%s4400_s11 + $0xc0] sm:$0xff] %vm2515_vm4, %v2507_v11  ;;  %v2508_v15 = vadd.f32 %v4394_v50, %v2469_v9  ;;  %v3194_v19 = vadd.f32 %v3193_v45, %v3192_v37  ;;  %v3305_v22 = vpop.f32.mrb[117].mxu1  ;;  %v3195_v24 = vpop.f32.mrb[118].mxu0 }
 0x254   : > { %v3306_v10 = vadd.f32 %v3305_v22, %v3304_v28  ;;  %v3307_v8 = vpop.f32.mrb[118].mxu1  ;;  %v3196_v40 = vpop.f32.mrb[119].mxu0 }
 0x255   : > { %2541 = vst.msk [vmem:[%s4400_s11 + $0xc8] sm:$0xff] %vm2515_vm4, %v2508_v15  ;;  %v2148_v29 = vadd.f32 %v3194_v19, %v4377_v52  ;;  %v3197_v27 = vadd.f32 %v3196_v40, %v3195_v24  ;;  %v3308_v56 = vpop.f32.mrb[119].mxu1 }
 0x256   : > { %v3309_v43 = vadd.f32 %v3308_v56, %v3307_v8 }
 0x257   : > { %v2470_v61 = vadd.f32 %v3306_v10, %v2148_v29  ;;  %v2149_v7 = vadd.f32 %v3197_v27, %v4379_v53 }
 0x259   : > { %v2509_v25 = vadd.f32 %v4394_v50, %v2470_v61  ;;  %v2471_v31 = vadd.f32 %v3309_v43, %v2149_v7  ;;  %v3198_v12 = vpop.f32.mrb[120].mxu0 }
 0x25a   : > { %v3310_v59 = vpop.f32.mrb[120].mxu1  ;;  %v3199_v1 = vpop.f32.mrb[121].mxu0 }
 0x25b   : > { %2542 = vst.msk [vmem:[%s4400_s11 + $0xd0] sm:$0xff] %vm2515_vm4, %v2509_v25  ;;  %v2510_v58 = vadd.f32 %v4394_v50, %v2471_v31  ;;  %v3200_v62 = vadd.f32 %v3199_v1, %v3198_v12  ;;  %v3311_v32 = vpop.f32.mrb[121].mxu1  ;;  %v3201_v52 = vpop.f32.mrb[122].mxu0 }
 0x25c   : > { %v3312_v16 = vadd.f32 %v3311_v32, %v3310_v59  ;;  %v3313_v2 = vpop.f32.mrb[122].mxu1  ;;  %v3202_v17 = vpop.f32.mrb[123].mxu0 }
 0x25d   : > { %2543 = vst.msk [vmem:[%s4400_s11 + $0xd8] sm:$0xff] %vm2515_vm4, %v2510_v58  ;;  %v2150_v53 = vadd.f32 %v3200_v62, %v4381_v47  ;;  %v3203_v3 = vadd.f32 %v3202_v17, %v3201_v52  ;;  %v3314_v0 = vpop.f32.mrb[123].mxu1 }
 0x25e   : > { %v3315_v41 = vadd.f32 %v3314_v0, %v3313_v2 }
 0x25f   : > { %v2472_v63 = vadd.f32 %v3312_v16, %v2150_v53  ;;  %v2151_v48 = vadd.f32 %v3203_v3, %v4383_v5 }
 0x261   : > { %v2511_v46 = vadd.f32 %v4394_v50, %v2472_v63  ;;  %v2473_v30 = vadd.f32 %v3315_v41, %v2151_v48  ;;  %v3204_v20 = vpop.f32.mrb[124].mxu0 }
 0x262   : > { %v3316_v26 = vpop.f32.mrb[124].mxu1  ;;  %v3205_v33 = vpop.f32.mrb[125].mxu0 }
 0x263   : > { %2544 = vst.msk [vmem:[%s4400_s11 + $0xe0] sm:$0xff] %vm2515_vm4, %v2511_v46  ;;  %v2512_v14 = vadd.f32 %v4394_v50, %v2473_v30  ;;  %v3206_v35 = vadd.f32 %v3205_v33, %v3204_v20  ;;  %v3317_v47 = vpop.f32.mrb[125].mxu1  ;;  %v3207_v36 = vpop.f32.mrb[126].mxu0 }
 0x264   : > { %v3318_v13 = vadd.f32 %v3317_v47, %v3316_v26  ;;  %v3319_v39 = vpop.f32.mrb[126].mxu1  ;;  %v3208_v49 = vpop.f32.mrb[127].mxu0 }
 0x265   : > { %2545 = vst.msk [vmem:[%s4400_s11 + $0xe8] sm:$0xff] %vm2515_vm4, %v2512_v14  ;;  %v2152_v5 = vadd.f32 %v3206_v35, %v4385_v42  ;;  %v3209_v54 = vadd.f32 %v3208_v49, %v3207_v36  ;;  %v3320_v44 = vpop.f32.mrb[127].mxu1 }
 0x266   : > { %v3321_v38 = vadd.f32 %v3320_v44, %v3319_v39 }
 0x267   : > { %v2474_v6 = vadd.f32 %v3318_v13, %v2152_v5  ;;  %v2153_v18 = vadd.f32 %v3209_v54, %v4387_v57 }
 0x269   : > { %v2513_v60 = vadd.f32 %v4394_v50, %v2474_v6  ;;  %v2475_v55 = vadd.f32 %v3321_v38, %v2153_v18 }
 0x26b   : > { %2546 = vst.msk [vmem:[%s4400_s11 + $0xf0] sm:$0xff] %vm2515_vm4, %v2513_v60  ;;  %v2514_v23 = vadd.f32 %v4394_v50, %v2475_v55 }
 0x26d   : > { %2547 = vst.msk [vmem:[%s4400_s11 + $0xf8] sm:$0xff] %vm2515_vm4, %v2514_v23 }
 0x26e PF: > { %s14_s17 = sadd.s32 1, %s3437_s17   ;;  %s4542_s15 = smov %s3433_s16 }
 0x26f   : > { %p11_p5 = scmp.ge.s32.totalorder %s14_s17, 4   ;;  %s4543_s16 = smov %s4545_s18 }
 0x271   :  { %13 = sbr.rel (!%p11_p5) target bundleno = 2 (0x2), region = 72 }

</bundles_post_ra>
